<compile_context>
chip_gen: v6e
topology: v6e:2x2x1
jax: 0.10.0
libtpu: 0.0.40
codegen_flags: <defaults>
</compile_context>

<pallas_src>
import functools

import jax
import jax.numpy as jnp
from jax import lax
from jax.experimental import pallas as pl
from jax.experimental.pallas import tpu as pltpu

V = 4  # fixed by the module: depth_sub_plus.split([2, 2], dim=1)


def _depthnet_kernel(cost_ref, dv_ref, prob_ref, dsp_ref, dvc_ref, conf_ref,
                     *, interval):
    # cost_ref: (V, D, TH, TW), dv_ref: (D, TH, TW)
    dv = dv_ref[...]

    # Per-view softmax + depth regression: ~4x smaller peak live data than
    # materialising the whole (V, D, TH, TW) block at once.
    dsp = []
    for v in range(V):
        c = cost_ref[v]                                  # (D, TH, TW)
        m = jnp.max(c, axis=0, keepdims=True)
        e = jnp.exp(c - m)
        s = jnp.sum(e, axis=0, keepdims=True)
        inv_s = 1.0 / s                                  # one divide per pixel-view (hoisted out of D)
        p = e * inv_s
        prob_ref[v] = p
        d = jnp.sum(p * dv, axis=0)                      # (TH, TW)
        dsp_ref[v] = d
        dsp.append(d)

    small_min = jnp.minimum(dsp[0], dsp[1])
    small_max = jnp.maximum(dsp[0], dsp[1])
    huge_min = jnp.minimum(dsp[2], dsp[3])
    huge_max = jnp.maximum(dsp[2], dsp[3])

    small_min_d = 2.0 * small_min - small_max
    small_max_d = 2.0 * small_max - small_min
    huge_min_d = 2.0 * huge_min - huge_max
    huge_max_d = 2.0 * huge_max - huge_min

    def stack6(lo, hi):
        return (3.0 * lo - 2.0 * hi, 2.0 * lo - hi, lo, hi,
                2.0 * hi - lo, 3.0 * hi - 2.0 * lo)

    small_stack = stack6(small_min, small_max)
    small_stack_d = stack6(small_min_d, small_max_d)
    huge_stack = stack6(huge_min, huge_max)
    huge_stack_d = stack6(huge_min_d, huge_max_d)

    # Block-local iotas are valid because TH % 4 == 0 and TW % 2 == 0
    # (enforced in the wrapper), so the global r%4 / c%2 phase is preserved.
    TH, TW = dsp[0].shape
    row = lax.broadcasted_iota(jnp.int32, (TH, TW), 0)
    col = lax.broadcasted_iota(jnp.int32, (TH, TW), 1)
    r4 = row % 4
    c2 = col % 2
    mask_00 = (r4 == 0) & (c2 == 0)
    mask_01 = (r4 == 0) & (c2 == 1)
    mask_10 = (r4 == 1) & (c2 == 0)
    mask_11 = (r4 == 1) & (c2 == 1)
    mask_20 = (r4 == 2) & (c2 == 0)
    mask_21 = (r4 == 2) & (c2 == 1)
    mask_30 = (r4 == 3) & (c2 == 0)
    mask_31 = (r4 == 3) & (c2 == 1)

    # depth_values_c per view (masks are a disjoint partition of the plane):
    #   mask_00 -> small_stack[:-2][v]   mask_01 -> small_stack[2:][v]
    #   mask_10 -> huge_stack[2:][v]     mask_11 -> huge_stack[:-2][v]
    #   mask_20 -> small_stack_d[:-2][v] mask_21 -> small_stack_d[2:][v]
    #   mask_30 -> huge_stack_d[2:][v]   mask_31 -> huge_stack_d[:-2][v]
    for v in range(V):
        val = jnp.zeros((TH, TW), jnp.float32)
        val = jnp.where(mask_00, small_stack[v], val)
        val = jnp.where(mask_01, small_stack[v + 2], val)
        val = jnp.where(mask_10, huge_stack[v + 2], val)
        val = jnp.where(mask_11, huge_stack[v], val)
        val = jnp.where(mask_20, small_stack_d[v], val)
        val = jnp.where(mask_21, small_stack_d[v + 2], val)
        val = jnp.where(mask_30, huge_stack_d[v + 2], val)
        val = jnp.where(mask_31, huge_stack_d[v], val)
        dvc_ref[v] = val

    # photometric confidence: 2*(sigmoid(interval / (std + 1e-5)) - 0.5),
    # std = sqrt(var(depth_sub_plus, dim=1, unbiased=False))
    mean = (dsp[0] + dsp[1] + dsp[2] + dsp[3]) * 0.25
    var = ((dsp[0] - mean) ** 2 + (dsp[1] - mean) ** 2 +
           (dsp[2] - mean) ** 2 + (dsp[3] - mean) ** 2) * 0.25
    std = jnp.sqrt(var)
    x = interval / (std + 1e-5)
    sig = 1.0 / (1.0 + jnp.exp(-x))
    conf_ref[...] = 2.0 * (sig - 0.5)


def _round_up(x, m):
    return ((x + m - 1) // m) * m


def _pick_tiles(D, H, W, target_bytes=2 * 1024 * 1024):
    """Pick (TH, TW, H_pad, W_pad).

    TW is a multiple of 128 (lane-dense, unmasked vst); TH a multiple of 8
    (sublane alignment, also a multiple of 4 for the checkerboard masks).
    Cost block is kept around ~target_bytes so double-buffered in+out blocks
    fit comfortably under the scoped VMEM limit on all generations.
    """
    w_pad = _round_up(W, 128)
    h_pad = _round_up(H, 8)
    tw = 128
    for cand in (512, 384, 256, 128):
        if cand <= w_pad and w_pad % cand == 0:
            tw = cand
            break
    th = 8
    for cand in (128, 64, 32, 16, 8):
        if cand <= h_pad and h_pad % cand == 0 and V * D * cand * tw * 4 <= target_bytes:
            th = cand
            break
    return th, tw, h_pad, w_pad


def depthnet_forward(cost_reg, depth_values, num_depth, interval,
                     prob_volume_init=None, stage=0):
    del num_depth, prob_volume_init, stage  # unused by the forward math
    cost_reg = jnp.asarray(cost_reg, jnp.float32)
    depth_values = jnp.asarray(depth_values, jnp.float32)
    B, Vv, D, H, W = cost_reg.shape
    assert Vv == V

    TH, TW, H_pad, W_pad = _pick_tiles(D, H, W)
    assert TH % 4 == 0 and TW % 2 == 0  # checkerboard mask phase per block

    if (H_pad, W_pad) != (H, W):
        cost_p = jnp.pad(cost_reg, ((0, 0), (0, 0), (0, 0),
                                    (0, H_pad - H), (0, W_pad - W)))
        dv_p = jnp.pad(depth_values, ((0, 0), (0, 0),
                                      (0, H_pad - H), (0, W_pad - W)))
    else:
        cost_p, dv_p = cost_reg, depth_values

    grid = (B, H_pad // TH, W_pad // TW)

    out_shapes = (
        jax.ShapeDtypeStruct((B, V, D, H_pad, W_pad), jnp.float32),  # prob_volume
        jax.ShapeDtypeStruct((B, V, H_pad, W_pad), jnp.float32),     # depth_sub_plus
        jax.ShapeDtypeStruct((B, V, H_pad, W_pad), jnp.float32),     # depth_values_c
        jax.ShapeDtypeStruct((B, H_pad, W_pad), jnp.float32),        # photometric_confidence
    )

    # VMEM budget: double-buffered in/out blocks + headroom, clamped so a
    # config tuned on v5e/v6e also fits v7x's 64 MiB physical VMEM.
    blk = 4 * TH * TW
    per_step_bytes = blk * (V * D + V * D + D + V + V + 1)
    vmem_limit = min(max(int(2.5 * per_step_bytes) + (2 << 20), 32 << 20),
                     60 << 20)

    grid_spec = pltpu.PrefetchScalarGridSpec(
        num_scalar_prefetch=0,
        grid=grid,
        in_specs=[
            pl.BlockSpec((None, V, D, TH, TW), lambda b, i, j: (b, 0, 0, i, j)),
            pl.BlockSpec((None, D, TH, TW), lambda b, i, j: (b, 0, i, j)),
        ],
        out_specs=[
            pl.BlockSpec((None, V, D, TH, TW), lambda b, i, j: (b, 0, 0, i, j)),
            pl.BlockSpec((None, V, TH, TW), lambda b, i, j: (b, 0, i, j)),
            pl.BlockSpec((None, V, TH, TW), lambda b, i, j: (b, 0, i, j)),
            pl.BlockSpec((None, TH, TW), lambda b, i, j: (b, i, j)),
        ],
    )

    kernel = functools.partial(_depthnet_kernel, interval=float(interval))

    prob_p, dsp_p, dvc_p, conf_p = pl.pallas_call(
        kernel,
        out_shape=out_shapes,
        grid_spec=grid_spec,
        compiler_params=pltpu.CompilerParams(
            dimension_semantics=("parallel", "parallel", "parallel"),
            vmem_limit_bytes=vmem_limit),
    )(cost_p, dv_p)

    # Strip any spatial padding added for lane/sublane alignment.
    prob_volume = prob_p[..., :H, :W]
    depth_sub_plus = dsp_p[..., :H, :W]
    depth_values_c = dvc_p[..., :H, :W]
    photometric_confidence = conf_p[..., :H, :W]

    return {
        'photometric_confidence': photometric_confidence,
        'prob_volume': prob_volume,
        'depth_sub_plus': depth_sub_plus,
        'depth_values_c': depth_values_c,
        'depth_values': depth_values,
        'interval': interval,
    }


def _reference_forward(cost_reg, depth_values, interval):
    """Pure-JAX reference mirroring the PyTorch semantics."""
    prob = jax.nn.softmax(cost_reg, axis=2)
    dsp = jnp.sum(prob * depth_values[:, None], axis=2)          # (B, 4, H, W)
    small_min = jnp.min(dsp[:, :2], axis=1)
    small_max = jnp.max(dsp[:, :2], axis=1)
    huge_min = jnp.min(dsp[:, 2:], axis=1)
    huge_max = jnp.max(dsp[:, 2:], axis=1)
    small_min_d, small_max_d = 2 * small_min - small_max, 2 * small_max - small_min
    huge_min_d, huge_max_d = 2 * huge_min - huge_max, 2 * huge_max - huge_min

    def stack6(lo, hi):
        return jnp.stack((3 * lo - 2 * hi, 2 * lo - hi, lo, hi,
                          2 * hi - lo, 3 * hi - 2 * lo), axis=1)

    ss, ssd = stack6(small_min, small_max), stack6(small_min_d, small_max_d)
    hs, hsd = stack6(huge_min, huge_max), stack6(huge_min_d, huge_max_d)

    B, _, H, W = dsp.shape
    row = jnp.arange(H)[:, None] * jnp.ones((1, W), jnp.int32)
    col = jnp.arange(W)[None, :] * jnp.ones((H, 1), jnp.int32)
    m = lambda a, b: ((row % 4 == a) & (col % 2 == b))[None, None]
    dvc = jnp.zeros_like(dsp)
    dvc = jnp.where(m(0, 0), ss[:, :-2], dvc)
    dvc = jnp.where(m(0, 1), ss[:, 2:], dvc)
    dvc = jnp.where(m(1, 0), hs[:, 2:], dvc)
    dvc = jnp.where(m(1, 1), hs[:, :-2], dvc)
    dvc = jnp.where(m(2, 0), ssd[:, :-2], dvc)
    dvc = jnp.where(m(2, 1), ssd[:, 2:], dvc)
    dvc = jnp.where(m(3, 0), hsd[:, 2:], dvc)
    dvc = jnp.where(m(3, 1), hsd[:, :-2], dvc)

    var = jnp.var(dsp, axis=1)
    conf = 2.0 * (jax.nn.sigmoid(interval / (jnp.sqrt(var) + 1e-5)) - 0.5)
    return prob, dsp, dvc, conf


if __name__ == "__main__":
    key = jax.random.PRNGKey(0)
    # Small but non-trivial shapes: H/W are NOT multiples of 8/128 so the
    # padding + multi-tile grid path is exercised.
    B, D, H, W = 2, 8, 20, 144
    k1, k2 = jax.random.split(key)
    cost_reg = jax.random.normal(k1, (B, V, D, H, W), dtype=jnp.float32)
    # per-pixel depth hypotheses, positive and deterministic
    depth_values = (jnp.linspace(1.0, 4.0, D, dtype=jnp.float32)[None, :, None, None]
                    + 0.1 * jax.random.uniform(k2, (B, D, H, W), dtype=jnp.float32))
    interval = 2.5

    out = depthnet_forward(cost_reg, depth_values, num_depth=D, interval=interval)
    jax.block_until_ready(out['photometric_confidence'])

    # correctness check against a pure-JAX reference
    ref_prob, ref_dsp, ref_dvc, ref_conf = _reference_forward(cost_reg, depth_values, interval)
    assert jnp.allclose(out['prob_volume'], ref_prob, atol=1e-5, rtol=1e-5)
    assert jnp.allclose(out['depth_sub_plus'], ref_dsp, atol=1e-5, rtol=1e-5)
    assert jnp.allclose(out['depth_values_c'], ref_dvc, atol=1e-4, rtol=1e-5)
    assert jnp.allclose(out['photometric_confidence'], ref_conf, atol=1e-5, rtol=1e-5)

    print("KERNEL_OK")
</pallas_src>

<mosaic_0001>
module attributes {stable_mosaic.version = 11 : i64} {
  func.func @_depthnet_kernel(%arg0: i32, %arg1: i32, %arg2: i32, %arg3: memref<1x4x8x8x256xf32, #tpu.memory_space<vmem>>, %arg4: memref<1x8x8x256xf32, #tpu.memory_space<vmem>>, %arg5: memref<1x4x8x8x256xf32, #tpu.memory_space<vmem>>, %arg6: memref<1x4x8x256xf32, #tpu.memory_space<vmem>>, %arg7: memref<1x4x8x256xf32, #tpu.memory_space<vmem>>, %arg8: memref<1x8x256xf32, #tpu.memory_space<vmem>>) attributes {dimension_semantics = [#tpu.dimension_semantics<parallel>, #tpu.dimension_semantics<parallel>, #tpu.dimension_semantics<parallel>], iteration_bounds = array<i64: 2, 3, 1>, scalar_prefetch = 0 : i64, scratch_operands = 0 : i64, tpu.core_type = #tpu.core_type<tc>, window_params = [{transform_indices = @transform_0, window_bounds = array<i64: 1, 4, 8, 8, 256>}, {transform_indices = @transform_1, window_bounds = array<i64: 1, 8, 8, 256>}, {transform_indices = @transform_2, window_bounds = array<i64: 1, 4, 8, 8, 256>}, {transform_indices = @transform_3, window_bounds = array<i64: 1, 4, 8, 256>}, {transform_indices = @transform_4, window_bounds = array<i64: 1, 4, 8, 256>}, {transform_indices = @transform_5, window_bounds = array<i64: 1, 8, 256>}]} {
    %c0 = arith.constant 0 : index
    %c0_0 = arith.constant 0 : index
    %c0_1 = arith.constant 0 : index
    %c0_2 = arith.constant 0 : index
    %0 = vector.load %arg4[%c0, %c0_0, %c0_1, %c0_2] : memref<1x8x8x256xf32, #tpu.memory_space<vmem>>, vector<1x8x8x256xf32>
    %1 = vector.shape_cast %0 : vector<1x8x8x256xf32> to vector<8x8x256xf32>
    %c0_3 = arith.constant 0 : index
    %c0_4 = arith.constant 0 : index
    %c0_5 = arith.constant 0 : index
    %c0_6 = arith.constant 0 : index
    %c0_7 = arith.constant 0 : index
    %2 = vector.load %arg3[%c0_3, %c0_4, %c0_5, %c0_6, %c0_7] : memref<1x4x8x8x256xf32, #tpu.memory_space<vmem>>, vector<1x1x8x8x256xf32>
    %3 = vector.shape_cast %2 : vector<1x1x8x8x256xf32> to vector<8x8x256xf32>
    %cst = arith.constant dense<0xFF800000> : vector<8x256xf32>
    %4 = vector.multi_reduction <maximumf>, %3, %cst [0] : vector<8x8x256xf32> to vector<8x256xf32>
    %5 = vector.shape_cast %4 : vector<8x256xf32> to vector<1x8x256xf32>
    %6 = vector.broadcast %5 : vector<1x8x256xf32> to vector<8x8x256xf32>
    %7 = arith.subf %3, %6 : vector<8x8x256xf32>
    %8 = math.exp %7 : vector<8x8x256xf32>
    %cst_8 = arith.constant dense<0.000000e+00> : vector<8x256xf32>
    %9 = vector.multi_reduction <add>, %8, %cst_8 [0] : vector<8x8x256xf32> to vector<8x256xf32>
    %10 = vector.shape_cast %9 : vector<8x256xf32> to vector<1x8x256xf32>
    %cst_9 = arith.constant 1.000000e+00 : f32
    %11 = vector.broadcast %cst_9 : f32 to vector<1x8x256xf32>
    %12 = arith.divf %11, %10 : vector<1x8x256xf32>
    %13 = vector.broadcast %12 : vector<1x8x256xf32> to vector<8x8x256xf32>
    %14 = arith.mulf %8, %13 : vector<8x8x256xf32>
    %c0_10 = arith.constant 0 : index
    %c0_11 = arith.constant 0 : index
    %c0_12 = arith.constant 0 : index
    %c0_13 = arith.constant 0 : index
    %c0_14 = arith.constant 0 : index
    %15 = vector.load %arg5[%c0_10, %c0_11, %c0_12, %c0_13, %c0_14] : memref<1x4x8x8x256xf32, #tpu.memory_space<vmem>>, vector<1x1x8x8x256xf32>
    %16 = vector.shape_cast %15 : vector<1x1x8x8x256xf32> to vector<8x8x256xf32>
    %17 = vector.shape_cast %14 : vector<8x8x256xf32> to vector<1x1x8x8x256xf32>
    tpu.vector_store %arg5[%c0_10, %c0_11, %c0_12, %c0_13, %c0_14], %17 {strides = array<i32>} : memref<1x4x8x8x256xf32, #tpu.memory_space<vmem>>, vector<1x1x8x8x256xf32>,
    %18 = arith.mulf %14, %1 : vector<8x8x256xf32>
    %cst_15 = arith.constant dense<0.000000e+00> : vector<8x256xf32>
    %19 = vector.multi_reduction <add>, %18, %cst_15 [0] : vector<8x8x256xf32> to vector<8x256xf32>
    %c0_16 = arith.constant 0 : index
    %c0_17 = arith.constant 0 : index
    %c0_18 = arith.constant 0 : index
    %c0_19 = arith.constant 0 : index
    %20 = vector.load %arg6[%c0_16, %c0_17, %c0_18, %c0_19] : memref<1x4x8x256xf32, #tpu.memory_space<vmem>>, vector<1x1x8x256xf32>
    %21 = vector.shape_cast %20 : vector<1x1x8x256xf32> to vector<8x256xf32>
    %22 = vector.shape_cast %19 : vector<8x256xf32> to vector<1x1x8x256xf32>
    tpu.vector_store %arg6[%c0_16, %c0_17, %c0_18, %c0_19], %22 {strides = array<i32>} : memref<1x4x8x256xf32, #tpu.memory_space<vmem>>, vector<1x1x8x256xf32>,
    %c0_20 = arith.constant 0 : index
    %c1 = arith.constant 1 : index
    %c0_21 = arith.constant 0 : index
    %c0_22 = arith.constant 0 : index
    %c0_23 = arith.constant 0 : index
    %23 = vector.load %arg3[%c0_20, %c1, %c0_21, %c0_22, %c0_23] : memref<1x4x8x8x256xf32, #tpu.memory_space<vmem>>, vector<1x1x8x8x256xf32>
    %24 = vector.shape_cast %23 : vector<1x1x8x8x256xf32> to vector<8x8x256xf32>
    %cst_24 = arith.constant dense<0xFF800000> : vector<8x256xf32>
    %25 = vector.multi_reduction <maximumf>, %24, %cst_24 [0] : vector<8x8x256xf32> to vector<8x256xf32>
    %26 = vector.shape_cast %25 : vector<8x256xf32> to vector<1x8x256xf32>
    %27 = vector.broadcast %26 : vector<1x8x256xf32> to vector<8x8x256xf32>
    %28 = arith.subf %24, %27 : vector<8x8x256xf32>
    %29 = math.exp %28 : vector<8x8x256xf32>
    %cst_25 = arith.constant dense<0.000000e+00> : vector<8x256xf32>
    %30 = vector.multi_reduction <add>, %29, %cst_25 [0] : vector<8x8x256xf32> to vector<8x256xf32>
    %31 = vector.shape_cast %30 : vector<8x256xf32> to vector<1x8x256xf32>
    %cst_26 = arith.constant 1.000000e+00 : f32
    %32 = vector.broadcast %cst_26 : f32 to vector<1x8x256xf32>
    %33 = arith.divf %32, %31 : vector<1x8x256xf32>
    %34 = vector.broadcast %33 : vector<1x8x256xf32> to vector<8x8x256xf32>
    %35 = arith.mulf %29, %34 : vector<8x8x256xf32>
    %c0_27 = arith.constant 0 : index
    %c1_28 = arith.constant 1 : index
    %c0_29 = arith.constant 0 : index
    %c0_30 = arith.constant 0 : index
    %c0_31 = arith.constant 0 : index
    %36 = vector.load %arg5[%c0_27, %c1_28, %c0_29, %c0_30, %c0_31] : memref<1x4x8x8x256xf32, #tpu.memory_space<vmem>>, vector<1x1x8x8x256xf32>
    %37 = vector.shape_cast %36 : vector<1x1x8x8x256xf32> to vector<8x8x256xf32>
    %38 = vector.shape_cast %35 : vector<8x8x256xf32> to vector<1x1x8x8x256xf32>
    tpu.vector_store %arg5[%c0_27, %c1_28, %c0_29, %c0_30, %c0_31], %38 {strides = array<i32>} : memref<1x4x8x8x256xf32, #tpu.memory_space<vmem>>, vector<1x1x8x8x256xf32>,
    %39 = arith.mulf %35, %1 : vector<8x8x256xf32>
    %cst_32 = arith.constant dense<0.000000e+00> : vector<8x256xf32>
    %40 = vector.multi_reduction <add>, %39, %cst_32 [0] : vector<8x8x256xf32> to vector<8x256xf32>
    %c0_33 = arith.constant 0 : index
    %c1_34 = arith.constant 1 : index
    %c0_35 = arith.constant 0 : index
    %c0_36 = arith.constant 0 : index
    %41 = vector.load %arg6[%c0_33, %c1_34, %c0_35, %c0_36] : memref<1x4x8x256xf32, #tpu.memory_space<vmem>>, vector<1x1x8x256xf32>
    %42 = vector.shape_cast %41 : vector<1x1x8x256xf32> to vector<8x256xf32>
    %43 = vector.shape_cast %40 : vector<8x256xf32> to vector<1x1x8x256xf32>
    tpu.vector_store %arg6[%c0_33, %c1_34, %c0_35, %c0_36], %43 {strides = array<i32>} : memref<1x4x8x256xf32, #tpu.memory_space<vmem>>, vector<1x1x8x256xf32>,
    %c0_37 = arith.constant 0 : index
    %c2 = arith.constant 2 : index
    %c0_38 = arith.constant 0 : index
    %c0_39 = arith.constant 0 : index
    %c0_40 = arith.constant 0 : index
    %44 = vector.load %arg3[%c0_37, %c2, %c0_38, %c0_39, %c0_40] : memref<1x4x8x8x256xf32, #tpu.memory_space<vmem>>, vector<1x1x8x8x256xf32>
    %45 = vector.shape_cast %44 : vector<1x1x8x8x256xf32> to vector<8x8x256xf32>
    %cst_41 = arith.constant dense<0xFF800000> : vector<8x256xf32>
    %46 = vector.multi_reduction <maximumf>, %45, %cst_41 [0] : vector<8x8x256xf32> to vector<8x256xf32>
    %47 = vector.shape_cast %46 : vector<8x256xf32> to vector<1x8x256xf32>
    %48 = vector.broadcast %47 : vector<1x8x256xf32> to vector<8x8x256xf32>
    %49 = arith.subf %45, %48 : vector<8x8x256xf32>
    %50 = math.exp %49 : vector<8x8x256xf32>
    %cst_42 = arith.constant dense<0.000000e+00> : vector<8x256xf32>
    %51 = vector.multi_reduction <add>, %50, %cst_42 [0] : vector<8x8x256xf32> to vector<8x256xf32>
    %52 = vector.shape_cast %51 : vector<8x256xf32> to vector<1x8x256xf32>
    %cst_43 = arith.constant 1.000000e+00 : f32
    %53 = vector.broadcast %cst_43 : f32 to vector<1x8x256xf32>
    %54 = arith.divf %53, %52 : vector<1x8x256xf32>
    %55 = vector.broadcast %54 : vector<1x8x256xf32> to vector<8x8x256xf32>
    %56 = arith.mulf %50, %55 : vector<8x8x256xf32>
    %c0_44 = arith.constant 0 : index
    %c2_45 = arith.constant 2 : index
    %c0_46 = arith.constant 0 : index
    %c0_47 = arith.constant 0 : index
    %c0_48 = arith.constant 0 : index
    %57 = vector.load %arg5[%c0_44, %c2_45, %c0_46, %c0_47, %c0_48] : memref<1x4x8x8x256xf32, #tpu.memory_space<vmem>>, vector<1x1x8x8x256xf32>
    %58 = vector.shape_cast %57 : vector<1x1x8x8x256xf32> to vector<8x8x256xf32>
    %59 = vector.shape_cast %56 : vector<8x8x256xf32> to vector<1x1x8x8x256xf32>
    tpu.vector_store %arg5[%c0_44, %c2_45, %c0_46, %c0_47, %c0_48], %59 {strides = array<i32>} : memref<1x4x8x8x256xf32, #tpu.memory_space<vmem>>, vector<1x1x8x8x256xf32>,
    %60 = arith.mulf %56, %1 : vector<8x8x256xf32>
    %cst_49 = arith.constant dense<0.000000e+00> : vector<8x256xf32>
    %61 = vector.multi_reduction <add>, %60, %cst_49 [0] : vector<8x8x256xf32> to vector<8x256xf32>
    %c0_50 = arith.constant 0 : index
    %c2_51 = arith.constant 2 : index
    %c0_52 = arith.constant 0 : index
    %c0_53 = arith.constant 0 : index
    %62 = vector.load %arg6[%c0_50, %c2_51, %c0_52, %c0_53] : memref<1x4x8x256xf32, #tpu.memory_space<vmem>>, vector<1x1x8x256xf32>
    %63 = vector.shape_cast %62 : vector<1x1x8x256xf32> to vector<8x256xf32>
    %64 = vector.shape_cast %61 : vector<8x256xf32> to vector<1x1x8x256xf32>
    tpu.vector_store %arg6[%c0_50, %c2_51, %c0_52, %c0_53], %64 {strides = array<i32>} : memref<1x4x8x256xf32, #tpu.memory_space<vmem>>, vector<1x1x8x256xf32>,
    %c0_54 = arith.constant 0 : index
    %c3 = arith.constant 3 : index
    %c0_55 = arith.constant 0 : index
    %c0_56 = arith.constant 0 : index
    %c0_57 = arith.constant 0 : index
    %65 = vector.load %arg3[%c0_54, %c3, %c0_55, %c0_56, %c0_57] : memref<1x4x8x8x256xf32, #tpu.memory_space<vmem>>, vector<1x1x8x8x256xf32>
    %66 = vector.shape_cast %65 : vector<1x1x8x8x256xf32> to vector<8x8x256xf32>
    %cst_58 = arith.constant dense<0xFF800000> : vector<8x256xf32>
    %67 = vector.multi_reduction <maximumf>, %66, %cst_58 [0] : vector<8x8x256xf32> to vector<8x256xf32>
    %68 = vector.shape_cast %67 : vector<8x256xf32> to vector<1x8x256xf32>
    %69 = vector.broadcast %68 : vector<1x8x256xf32> to vector<8x8x256xf32>
    %70 = arith.subf %66, %69 : vector<8x8x256xf32>
    %71 = math.exp %70 : vector<8x8x256xf32>
    %cst_59 = arith.constant dense<0.000000e+00> : vector<8x256xf32>
    %72 = vector.multi_reduction <add>, %71, %cst_59 [0] : vector<8x8x256xf32> to vector<8x256xf32>
    %73 = vector.shape_cast %72 : vector<8x256xf32> to vector<1x8x256xf32>
    %cst_60 = arith.constant 1.000000e+00 : f32
    %74 = vector.broadcast %cst_60 : f32 to vector<1x8x256xf32>
    %75 = arith.divf %74, %73 : vector<1x8x256xf32>
    %76 = vector.broadcast %75 : vector<1x8x256xf32> to vector<8x8x256xf32>
    %77 = arith.mulf %71, %76 : vector<8x8x256xf32>
    %c0_61 = arith.constant 0 : index
    %c3_62 = arith.constant 3 : index
    %c0_63 = arith.constant 0 : index
    %c0_64 = arith.constant 0 : index
    %c0_65 = arith.constant 0 : index
    %78 = vector.load %arg5[%c0_61, %c3_62, %c0_63, %c0_64, %c0_65] : memref<1x4x8x8x256xf32, #tpu.memory_space<vmem>>, vector<1x1x8x8x256xf32>
    %79 = vector.shape_cast %78 : vector<1x1x8x8x256xf32> to vector<8x8x256xf32>
    %80 = vector.shape_cast %77 : vector<8x8x256xf32> to vector<1x1x8x8x256xf32>
    tpu.vector_store %arg5[%c0_61, %c3_62, %c0_63, %c0_64, %c0_65], %80 {strides = array<i32>} : memref<1x4x8x8x256xf32, #tpu.memory_space<vmem>>, vector<1x1x8x8x256xf32>,
    %81 = arith.mulf %77, %1 : vector<8x8x256xf32>
    %cst_66 = arith.constant dense<0.000000e+00> : vector<8x256xf32>
    %82 = vector.multi_reduction <add>, %81, %cst_66 [0] : vector<8x8x256xf32> to vector<8x256xf32>
    %c0_67 = arith.constant 0 : index
    %c3_68 = arith.constant 3 : index
    %c0_69 = arith.constant 0 : index
    %c0_70 = arith.constant 0 : index
    %83 = vector.load %arg6[%c0_67, %c3_68, %c0_69, %c0_70] : memref<1x4x8x256xf32, #tpu.memory_space<vmem>>, vector<1x1x8x256xf32>
    %84 = vector.shape_cast %83 : vector<1x1x8x256xf32> to vector<8x256xf32>
    %85 = vector.shape_cast %82 : vector<8x256xf32> to vector<1x1x8x256xf32>
    tpu.vector_store %arg6[%c0_67, %c3_68, %c0_69, %c0_70], %85 {strides = array<i32>} : memref<1x4x8x256xf32, #tpu.memory_space<vmem>>, vector<1x1x8x256xf32>,
    %86 = arith.minimumf %19, %40 : vector<8x256xf32>
    %87 = arith.maximumf %19, %40 : vector<8x256xf32>
    %88 = arith.minimumf %61, %82 : vector<8x256xf32>
    %89 = arith.maximumf %61, %82 : vector<8x256xf32>
    %cst_71 = arith.constant 2.000000e+00 : f32
    %90 = vector.broadcast %cst_71 : f32 to vector<8x256xf32>
    %91 = arith.mulf %90, %86 : vector<8x256xf32>
    %92 = arith.subf %91, %87 : vector<8x256xf32>
    %cst_72 = arith.constant 2.000000e+00 : f32
    %93 = vector.broadcast %cst_72 : f32 to vector<8x256xf32>
    %94 = arith.mulf %93, %87 : vector<8x256xf32>
    %95 = arith.subf %94, %86 : vector<8x256xf32>
    %cst_73 = arith.constant 2.000000e+00 : f32
    %96 = vector.broadcast %cst_73 : f32 to vector<8x256xf32>
    %97 = arith.mulf %96, %88 : vector<8x256xf32>
    %98 = arith.subf %97, %89 : vector<8x256xf32>
    %cst_74 = arith.constant 2.000000e+00 : f32
    %99 = vector.broadcast %cst_74 : f32 to vector<8x256xf32>
    %100 = arith.mulf %99, %89 : vector<8x256xf32>
    %101 = arith.subf %100, %88 : vector<8x256xf32>
    %cst_75 = arith.constant 3.000000e+00 : f32
    %102 = vector.broadcast %cst_75 : f32 to vector<8x256xf32>
    %103 = arith.mulf %102, %86 : vector<8x256xf32>
    %cst_76 = arith.constant 2.000000e+00 : f32
    %104 = vector.broadcast %cst_76 : f32 to vector<8x256xf32>
    %105 = arith.mulf %104, %87 : vector<8x256xf32>
    %106 = arith.subf %103, %105 : vector<8x256xf32>
    %cst_77 = arith.constant 2.000000e+00 : f32
    %107 = vector.broadcast %cst_77 : f32 to vector<8x256xf32>
    %108 = arith.mulf %107, %86 : vector<8x256xf32>
    %109 = arith.subf %108, %87 : vector<8x256xf32>
    %cst_78 = arith.constant 2.000000e+00 : f32
    %110 = vector.broadcast %cst_78 : f32 to vector<8x256xf32>
    %111 = arith.mulf %110, %87 : vector<8x256xf32>
    %112 = arith.subf %111, %86 : vector<8x256xf32>
    %cst_79 = arith.constant 3.000000e+00 : f32
    %113 = vector.broadcast %cst_79 : f32 to vector<8x256xf32>
    %114 = arith.mulf %113, %87 : vector<8x256xf32>
    %cst_80 = arith.constant 2.000000e+00 : f32
    %115 = vector.broadcast %cst_80 : f32 to vector<8x256xf32>
    %116 = arith.mulf %115, %86 : vector<8x256xf32>
    %117 = arith.subf %114, %116 : vector<8x256xf32>
    %cst_81 = arith.constant 3.000000e+00 : f32
    %118 = vector.broadcast %cst_81 : f32 to vector<8x256xf32>
    %119 = arith.mulf %118, %92 : vector<8x256xf32>
    %cst_82 = arith.constant 2.000000e+00 : f32
    %120 = vector.broadcast %cst_82 : f32 to vector<8x256xf32>
    %121 = arith.mulf %120, %95 : vector<8x256xf32>
    %122 = arith.subf %119, %121 : vector<8x256xf32>
    %cst_83 = arith.constant 2.000000e+00 : f32
    %123 = vector.broadcast %cst_83 : f32 to vector<8x256xf32>
    %124 = arith.mulf %123, %92 : vector<8x256xf32>
    %125 = arith.subf %124, %95 : vector<8x256xf32>
    %cst_84 = arith.constant 2.000000e+00 : f32
    %126 = vector.broadcast %cst_84 : f32 to vector<8x256xf32>
    %127 = arith.mulf %126, %95 : vector<8x256xf32>
    %128 = arith.subf %127, %92 : vector<8x256xf32>
    %cst_85 = arith.constant 3.000000e+00 : f32
    %129 = vector.broadcast %cst_85 : f32 to vector<8x256xf32>
    %130 = arith.mulf %129, %95 : vector<8x256xf32>
    %cst_86 = arith.constant 2.000000e+00 : f32
    %131 = vector.broadcast %cst_86 : f32 to vector<8x256xf32>
    %132 = arith.mulf %131, %92 : vector<8x256xf32>
    %133 = arith.subf %130, %132 : vector<8x256xf32>
    %cst_87 = arith.constant 3.000000e+00 : f32
    %134 = vector.broadcast %cst_87 : f32 to vector<8x256xf32>
    %135 = arith.mulf %134, %88 : vector<8x256xf32>
    %cst_88 = arith.constant 2.000000e+00 : f32
    %136 = vector.broadcast %cst_88 : f32 to vector<8x256xf32>
    %137 = arith.mulf %136, %89 : vector<8x256xf32>
    %138 = arith.subf %135, %137 : vector<8x256xf32>
    %cst_89 = arith.constant 2.000000e+00 : f32
    %139 = vector.broadcast %cst_89 : f32 to vector<8x256xf32>
    %140 = arith.mulf %139, %88 : vector<8x256xf32>
    %141 = arith.subf %140, %89 : vector<8x256xf32>
    %cst_90 = arith.constant 2.000000e+00 : f32
    %142 = vector.broadcast %cst_90 : f32 to vector<8x256xf32>
    %143 = arith.mulf %142, %89 : vector<8x256xf32>
    %144 = arith.subf %143, %88 : vector<8x256xf32>
    %cst_91 = arith.constant 3.000000e+00 : f32
    %145 = vector.broadcast %cst_91 : f32 to vector<8x256xf32>
    %146 = arith.mulf %145, %89 : vector<8x256xf32>
    %cst_92 = arith.constant 2.000000e+00 : f32
    %147 = vector.broadcast %cst_92 : f32 to vector<8x256xf32>
    %148 = arith.mulf %147, %88 : vector<8x256xf32>
    %149 = arith.subf %146, %148 : vector<8x256xf32>
    %cst_93 = arith.constant 3.000000e+00 : f32
    %150 = vector.broadcast %cst_93 : f32 to vector<8x256xf32>
    %151 = arith.mulf %150, %98 : vector<8x256xf32>
    %cst_94 = arith.constant 2.000000e+00 : f32
    %152 = vector.broadcast %cst_94 : f32 to vector<8x256xf32>
    %153 = arith.mulf %152, %101 : vector<8x256xf32>
    %154 = arith.subf %151, %153 : vector<8x256xf32>
    %cst_95 = arith.constant 2.000000e+00 : f32
    %155 = vector.broadcast %cst_95 : f32 to vector<8x256xf32>
    %156 = arith.mulf %155, %98 : vector<8x256xf32>
    %157 = arith.subf %156, %101 : vector<8x256xf32>
    %cst_96 = arith.constant 2.000000e+00 : f32
    %158 = vector.broadcast %cst_96 : f32 to vector<8x256xf32>
    %159 = arith.mulf %158, %101 : vector<8x256xf32>
    %160 = arith.subf %159, %98 : vector<8x256xf32>
    %cst_97 = arith.constant 3.000000e+00 : f32
    %161 = vector.broadcast %cst_97 : f32 to vector<8x256xf32>
    %162 = arith.mulf %161, %101 : vector<8x256xf32>
    %cst_98 = arith.constant 2.000000e+00 : f32
    %163 = vector.broadcast %cst_98 : f32 to vector<8x256xf32>
    %164 = arith.mulf %163, %98 : vector<8x256xf32>
    %165 = arith.subf %162, %164 : vector<8x256xf32>
    %166 = tpu.iota {dimensions = array<i32: 0>} : vector<8x256xi32>
    %167 = tpu.iota {dimensions = array<i32: 1>} : vector<8x256xi32>
    %c4_i32 = arith.constant 4 : i32
    %c0_i32 = arith.constant 0 : i32
    %168 = arith.cmpi eq, %c4_i32, %c0_i32 : i32
    %c1_i32 = arith.constant 1 : i32
    %169 = arith.select %168, %c1_i32, %c4_i32 : i32
    %170 = vector.broadcast %169 : i32 to vector<8x256xi32>
    %171 = arith.remsi %166, %170 : vector<8x256xi32>
    %c0_i32_99 = arith.constant 0 : i32
    %172 = vector.broadcast %c0_i32_99 : i32 to vector<8x256xi32>
    %173 = arith.cmpi ne, %171, %172 : vector<8x256xi32>
    %c0_i32_100 = arith.constant 0 : i32
    %174 = vector.broadcast %c0_i32_100 : i32 to vector<8x256xi32>
    %175 = arith.cmpi slt, %171, %174 : vector<8x256xi32>
    %c0_i32_101 = arith.constant 0 : i32
    %176 = arith.cmpi slt, %169, %c0_i32_101 : i32
    %177 = vector.broadcast %176 : i1 to vector<8x256xi1>
    %178 = vector.broadcast %177 : vector<8x256xi1> to vector<8x256xi1>
    %179 = arith.xori %175, %178 : vector<8x256xi1>
    %180 = arith.andi %179, %173 : vector<8x256xi1>
    %181 = vector.broadcast %169 : i32 to vector<8x256xi32>
    %182 = arith.addi %171, %181 : vector<8x256xi32>
    %183 = arith.select %180, %182, %171 : vector<8x256xi1>, vector<8x256xi32>
    %c2_i32 = arith.constant 2 : i32
    %c0_i32_102 = arith.constant 0 : i32
    %184 = arith.cmpi eq, %c2_i32, %c0_i32_102 : i32
    %c1_i32_103 = arith.constant 1 : i32
    %185 = arith.select %184, %c1_i32_103, %c2_i32 : i32
    %186 = vector.broadcast %185 : i32 to vector<8x256xi32>
    %187 = arith.remsi %167, %186 : vector<8x256xi32>
    %c0_i32_104 = arith.constant 0 : i32
    %188 = vector.broadcast %c0_i32_104 : i32 to vector<8x256xi32>
    %189 = arith.cmpi ne, %187, %188 : vector<8x256xi32>
    %c0_i32_105 = arith.constant 0 : i32
    %190 = vector.broadcast %c0_i32_105 : i32 to vector<8x256xi32>
    %191 = arith.cmpi slt, %187, %190 : vector<8x256xi32>
    %c0_i32_106 = arith.constant 0 : i32
    %192 = arith.cmpi slt, %185, %c0_i32_106 : i32
    %193 = vector.broadcast %192 : i1 to vector<8x256xi1>
    %194 = vector.broadcast %193 : vector<8x256xi1> to vector<8x256xi1>
    %195 = arith.xori %191, %194 : vector<8x256xi1>
    %196 = arith.andi %195, %189 : vector<8x256xi1>
    %197 = vector.broadcast %185 : i32 to vector<8x256xi32>
    %198 = arith.addi %187, %197 : vector<8x256xi32>
    %199 = arith.select %196, %198, %187 : vector<8x256xi1>, vector<8x256xi32>
    %c0_i32_107 = arith.constant 0 : i32
    %200 = vector.broadcast %c0_i32_107 : i32 to vector<8x256xi32>
    %201 = arith.cmpi eq, %183, %200 : vector<8x256xi32>
    %c0_i32_108 = arith.constant 0 : i32
    %202 = vector.broadcast %c0_i32_108 : i32 to vector<8x256xi32>
    %203 = arith.cmpi eq, %199, %202 : vector<8x256xi32>
    %204 = arith.andi %201, %203 : vector<8x256xi1>
    %c0_i32_109 = arith.constant 0 : i32
    %205 = vector.broadcast %c0_i32_109 : i32 to vector<8x256xi32>
    %206 = arith.cmpi eq, %183, %205 : vector<8x256xi32>
    %c1_i32_110 = arith.constant 1 : i32
    %207 = vector.broadcast %c1_i32_110 : i32 to vector<8x256xi32>
    %208 = arith.cmpi eq, %199, %207 : vector<8x256xi32>
    %209 = arith.andi %206, %208 : vector<8x256xi1>
    %c1_i32_111 = arith.constant 1 : i32
    %210 = vector.broadcast %c1_i32_111 : i32 to vector<8x256xi32>
    %211 = arith.cmpi eq, %183, %210 : vector<8x256xi32>
    %c0_i32_112 = arith.constant 0 : i32
    %212 = vector.broadcast %c0_i32_112 : i32 to vector<8x256xi32>
    %213 = arith.cmpi eq, %199, %212 : vector<8x256xi32>
    %214 = arith.andi %211, %213 : vector<8x256xi1>
    %c1_i32_113 = arith.constant 1 : i32
    %215 = vector.broadcast %c1_i32_113 : i32 to vector<8x256xi32>
    %216 = arith.cmpi eq, %183, %215 : vector<8x256xi32>
    %c1_i32_114 = arith.constant 1 : i32
    %217 = vector.broadcast %c1_i32_114 : i32 to vector<8x256xi32>
    %218 = arith.cmpi eq, %199, %217 : vector<8x256xi32>
    %219 = arith.andi %216, %218 : vector<8x256xi1>
    %c2_i32_115 = arith.constant 2 : i32
    %220 = vector.broadcast %c2_i32_115 : i32 to vector<8x256xi32>
    %221 = arith.cmpi eq, %183, %220 : vector<8x256xi32>
    %c0_i32_116 = arith.constant 0 : i32
    %222 = vector.broadcast %c0_i32_116 : i32 to vector<8x256xi32>
    %223 = arith.cmpi eq, %199, %222 : vector<8x256xi32>
    %224 = arith.andi %221, %223 : vector<8x256xi1>
    %c2_i32_117 = arith.constant 2 : i32
    %225 = vector.broadcast %c2_i32_117 : i32 to vector<8x256xi32>
    %226 = arith.cmpi eq, %183, %225 : vector<8x256xi32>
    %c1_i32_118 = arith.constant 1 : i32
    %227 = vector.broadcast %c1_i32_118 : i32 to vector<8x256xi32>
    %228 = arith.cmpi eq, %199, %227 : vector<8x256xi32>
    %229 = arith.andi %226, %228 : vector<8x256xi1>
    %c3_i32 = arith.constant 3 : i32
    %230 = vector.broadcast %c3_i32 : i32 to vector<8x256xi32>
    %231 = arith.cmpi eq, %183, %230 : vector<8x256xi32>
    %c0_i32_119 = arith.constant 0 : i32
    %232 = vector.broadcast %c0_i32_119 : i32 to vector<8x256xi32>
    %233 = arith.cmpi eq, %199, %232 : vector<8x256xi32>
    %234 = arith.andi %231, %233 : vector<8x256xi1>
    %c3_i32_120 = arith.constant 3 : i32
    %235 = vector.broadcast %c3_i32_120 : i32 to vector<8x256xi32>
    %236 = arith.cmpi eq, %183, %235 : vector<8x256xi32>
    %c1_i32_121 = arith.constant 1 : i32
    %237 = vector.broadcast %c1_i32_121 : i32 to vector<8x256xi32>
    %238 = arith.cmpi eq, %199, %237 : vector<8x256xi32>
    %239 = arith.andi %236, %238 : vector<8x256xi1>
    %cst_122 = arith.constant 0.000000e+00 : f32
    %240 = vector.broadcast %cst_122 : f32 to vector<8x256xf32>
    %241 = arith.select %204, %106, %240 : vector<8x256xi1>, vector<8x256xf32>
    %242 = arith.select %209, %86, %241 : vector<8x256xi1>, vector<8x256xf32>
    %243 = arith.select %214, %88, %242 : vector<8x256xi1>, vector<8x256xf32>
    %244 = arith.select %219, %138, %243 : vector<8x256xi1>, vector<8x256xf32>
    %245 = arith.select %224, %122, %244 : vector<8x256xi1>, vector<8x256xf32>
    %246 = arith.select %229, %92, %245 : vector<8x256xi1>, vector<8x256xf32>
    %247 = arith.select %234, %98, %246 : vector<8x256xi1>, vector<8x256xf32>
    %248 = arith.select %239, %154, %247 : vector<8x256xi1>, vector<8x256xf32>
    %c0_123 = arith.constant 0 : index
    %c0_124 = arith.constant 0 : index
    %c0_125 = arith.constant 0 : index
    %c0_126 = arith.constant 0 : index
    %249 = vector.load %arg7[%c0_123, %c0_124, %c0_125, %c0_126] : memref<1x4x8x256xf32, #tpu.memory_space<vmem>>, vector<1x1x8x256xf32>
    %250 = vector.shape_cast %249 : vector<1x1x8x256xf32> to vector<8x256xf32>
    %251 = vector.shape_cast %248 : vector<8x256xf32> to vector<1x1x8x256xf32>
    tpu.vector_store %arg7[%c0_123, %c0_124, %c0_125, %c0_126], %251 {strides = array<i32>} : memref<1x4x8x256xf32, #tpu.memory_space<vmem>>, vector<1x1x8x256xf32>,
    %cst_127 = arith.constant 0.000000e+00 : f32
    %252 = vector.broadcast %cst_127 : f32 to vector<8x256xf32>
    %253 = arith.select %204, %109, %252 : vector<8x256xi1>, vector<8x256xf32>
    %254 = arith.select %209, %87, %253 : vector<8x256xi1>, vector<8x256xf32>
    %255 = arith.select %214, %89, %254 : vector<8x256xi1>, vector<8x256xf32>
    %256 = arith.select %219, %141, %255 : vector<8x256xi1>, vector<8x256xf32>
    %257 = arith.select %224, %125, %256 : vector<8x256xi1>, vector<8x256xf32>
    %258 = arith.select %229, %95, %257 : vector<8x256xi1>, vector<8x256xf32>
    %259 = arith.select %234, %101, %258 : vector<8x256xi1>, vector<8x256xf32>
    %260 = arith.select %239, %157, %259 : vector<8x256xi1>, vector<8x256xf32>
    %c0_128 = arith.constant 0 : index
    %c1_129 = arith.constant 1 : index
    %c0_130 = arith.constant 0 : index
    %c0_131 = arith.constant 0 : index
    %261 = vector.load %arg7[%c0_128, %c1_129, %c0_130, %c0_131] : memref<1x4x8x256xf32, #tpu.memory_space<vmem>>, vector<1x1x8x256xf32>
    %262 = vector.shape_cast %261 : vector<1x1x8x256xf32> to vector<8x256xf32>
    %263 = vector.shape_cast %260 : vector<8x256xf32> to vector<1x1x8x256xf32>
    tpu.vector_store %arg7[%c0_128, %c1_129, %c0_130, %c0_131], %263 {strides = array<i32>} : memref<1x4x8x256xf32, #tpu.memory_space<vmem>>, vector<1x1x8x256xf32>,
    %cst_132 = arith.constant 0.000000e+00 : f32
    %264 = vector.broadcast %cst_132 : f32 to vector<8x256xf32>
    %265 = arith.select %204, %86, %264 : vector<8x256xi1>, vector<8x256xf32>
    %266 = arith.select %209, %112, %265 : vector<8x256xi1>, vector<8x256xf32>
    %267 = arith.select %214, %144, %266 : vector<8x256xi1>, vector<8x256xf32>
    %268 = arith.select %219, %88, %267 : vector<8x256xi1>, vector<8x256xf32>
    %269 = arith.select %224, %92, %268 : vector<8x256xi1>, vector<8x256xf32>
    %270 = arith.select %229, %128, %269 : vector<8x256xi1>, vector<8x256xf32>
    %271 = arith.select %234, %160, %270 : vector<8x256xi1>, vector<8x256xf32>
    %272 = arith.select %239, %98, %271 : vector<8x256xi1>, vector<8x256xf32>
    %c0_133 = arith.constant 0 : index
    %c2_134 = arith.constant 2 : index
    %c0_135 = arith.constant 0 : index
    %c0_136 = arith.constant 0 : index
    %273 = vector.load %arg7[%c0_133, %c2_134, %c0_135, %c0_136] : memref<1x4x8x256xf32, #tpu.memory_space<vmem>>, vector<1x1x8x256xf32>
    %274 = vector.shape_cast %273 : vector<1x1x8x256xf32> to vector<8x256xf32>
    %275 = vector.shape_cast %272 : vector<8x256xf32> to vector<1x1x8x256xf32>
    tpu.vector_store %arg7[%c0_133, %c2_134, %c0_135, %c0_136], %275 {strides = array<i32>} : memref<1x4x8x256xf32, #tpu.memory_space<vmem>>, vector<1x1x8x256xf32>,
    %cst_137 = arith.constant 0.000000e+00 : f32
    %276 = vector.broadcast %cst_137 : f32 to vector<8x256xf32>
    %277 = arith.select %204, %87, %276 : vector<8x256xi1>, vector<8x256xf32>
    %278 = arith.select %209, %117, %277 : vector<8x256xi1>, vector<8x256xf32>
    %279 = arith.select %214, %149, %278 : vector<8x256xi1>, vector<8x256xf32>
    %280 = arith.select %219, %89, %279 : vector<8x256xi1>, vector<8x256xf32>
    %281 = arith.select %224, %95, %280 : vector<8x256xi1>, vector<8x256xf32>
    %282 = arith.select %229, %133, %281 : vector<8x256xi1>, vector<8x256xf32>
    %283 = arith.select %234, %165, %282 : vector<8x256xi1>, vector<8x256xf32>
    %284 = arith.select %239, %101, %283 : vector<8x256xi1>, vector<8x256xf32>
    %c0_138 = arith.constant 0 : index
    %c3_139 = arith.constant 3 : index
    %c0_140 = arith.constant 0 : index
    %c0_141 = arith.constant 0 : index
    %285 = vector.load %arg7[%c0_138, %c3_139, %c0_140, %c0_141] : memref<1x4x8x256xf32, #tpu.memory_space<vmem>>, vector<1x1x8x256xf32>
    %286 = vector.shape_cast %285 : vector<1x1x8x256xf32> to vector<8x256xf32>
    %287 = vector.shape_cast %284 : vector<8x256xf32> to vector<1x1x8x256xf32>
    tpu.vector_store %arg7[%c0_138, %c3_139, %c0_140, %c0_141], %287 {strides = array<i32>} : memref<1x4x8x256xf32, #tpu.memory_space<vmem>>, vector<1x1x8x256xf32>,
    %288 = arith.addf %19, %40 : vector<8x256xf32>
    %289 = arith.addf %288, %61 : vector<8x256xf32>
    %290 = arith.addf %289, %82 : vector<8x256xf32>
    %cst_142 = arith.constant 2.500000e-01 : f32
    %291 = vector.broadcast %cst_142 : f32 to vector<8x256xf32>
    %292 = arith.mulf %290, %291 : vector<8x256xf32>
    %293 = arith.subf %19, %292 : vector<8x256xf32>
    %294 = arith.mulf %293, %293 : vector<8x256xf32>
    %295 = arith.subf %40, %292 : vector<8x256xf32>
    %296 = arith.mulf %295, %295 : vector<8x256xf32>
    %297 = arith.addf %294, %296 : vector<8x256xf32>
    %298 = arith.subf %61, %292 : vector<8x256xf32>
    %299 = arith.mulf %298, %298 : vector<8x256xf32>
    %300 = arith.addf %297, %299 : vector<8x256xf32>
    %301 = arith.subf %82, %292 : vector<8x256xf32>
    %302 = arith.mulf %301, %301 : vector<8x256xf32>
    %303 = arith.addf %300, %302 : vector<8x256xf32>
    %cst_143 = arith.constant 2.500000e-01 : f32
    %304 = vector.broadcast %cst_143 : f32 to vector<8x256xf32>
    %305 = arith.mulf %303, %304 : vector<8x256xf32>
    %306 = math.sqrt %305 : vector<8x256xf32>
    %cst_144 = arith.constant 9.99999974E-6 : f32
    %307 = vector.broadcast %cst_144 : f32 to vector<8x256xf32>
    %308 = arith.addf %306, %307 : vector<8x256xf32>
    %cst_145 = arith.constant 2.500000e+00 : f32
    %309 = vector.broadcast %cst_145 : f32 to vector<8x256xf32>
    %310 = arith.divf %309, %308 : vector<8x256xf32>
    %cst_146 = arith.constant 0.000000e+00 : f32
    %311 = vector.broadcast %cst_146 : f32 to vector<8x256xf32>
    %312 = arith.subf %311, %310 : vector<8x256xf32>
    %313 = math.exp %312 : vector<8x256xf32>
    %cst_147 = arith.constant 1.000000e+00 : f32
    %314 = vector.broadcast %cst_147 : f32 to vector<8x256xf32>
    %315 = arith.addf %314, %313 : vector<8x256xf32>
    %cst_148 = arith.constant 1.000000e+00 : f32
    %316 = vector.broadcast %cst_148 : f32 to vector<8x256xf32>
    %317 = arith.divf %316, %315 : vector<8x256xf32>
    %cst_149 = arith.constant 5.000000e-01 : f32
    %318 = vector.broadcast %cst_149 : f32 to vector<8x256xf32>
    %319 = arith.subf %317, %318 : vector<8x256xf32>
    %cst_150 = arith.constant 2.000000e+00 : f32
    %320 = vector.broadcast %cst_150 : f32 to vector<8x256xf32>
    %321 = arith.mulf %320, %319 : vector<8x256xf32>
    %c0_151 = arith.constant 0 : index
    %c0_152 = arith.constant 0 : index
    %c0_153 = arith.constant 0 : index
    %322 = vector.load %arg8[%c0_151, %c0_152, %c0_153] : memref<1x8x256xf32, #tpu.memory_space<vmem>>, vector<1x8x256xf32>
    %323 = vector.shape_cast %322 : vector<1x8x256xf32> to vector<8x256xf32>
    %324 = vector.shape_cast %321 : vector<8x256xf32> to vector<1x8x256xf32>
    tpu.vector_store %arg8[%c0_151, %c0_152, %c0_153], %324 {strides = array<i32>} : memref<1x8x256xf32, #tpu.memory_space<vmem>>, vector<1x8x256xf32>,
    return
  }
  func.func @transform_0(%arg0: i32, %arg1: i32, %arg2: i32) -> (i32, i32, i32, i32, i32) {
    %c0_i32 = arith.constant 0 : i32
    %c0_i32_0 = arith.constant 0 : i32
    %c0_i32_1 = arith.constant 0 : i32
    return %arg0, %c0_i32, %c0_i32_0, %arg1, %arg2 : i32, i32, i32, i32, i32
  }
  func.func @transform_1(%arg0: i32, %arg1: i32, %arg2: i32) -> (i32, i32, i32, i32) {
    %c0_i32 = arith.constant 0 : i32
    %c0_i32_0 = arith.constant 0 : i32
    return %arg0, %c0_i32, %arg1, %arg2 : i32, i32, i32, i32
  }
  func.func @transform_2(%arg0: i32, %arg1: i32, %arg2: i32) -> (i32, i32, i32, i32, i32) {
    %c0_i32 = arith.constant 0 : i32
    %c0_i32_0 = arith.constant 0 : i32
    %c0_i32_1 = arith.constant 0 : i32
    return %arg0, %c0_i32, %c0_i32_0, %arg1, %arg2 : i32, i32, i32, i32, i32
  }
  func.func @transform_3(%arg0: i32, %arg1: i32, %arg2: i32) -> (i32, i32, i32, i32) {
    %c0_i32 = arith.constant 0 : i32
    %c0_i32_0 = arith.constant 0 : i32
    return %arg0, %c0_i32, %arg1, %arg2 : i32, i32, i32, i32
  }
  func.func @transform_4(%arg0: i32, %arg1: i32, %arg2: i32) -> (i32, i32, i32, i32) {
    %c0_i32 = arith.constant 0 : i32
    %c0_i32_0 = arith.constant 0 : i32
    return %arg0, %c0_i32, %arg1, %arg2 : i32, i32, i32, i32
  }
  func.func @transform_5(%arg0: i32, %arg1: i32, %arg2: i32) -> (i32, i32, i32) {
    %c0_i32 = arith.constant 0 : i32
    return %arg0, %arg1, %arg2 : i32, i32, i32
  }
}

</mosaic_0001>

<bundles_post_ra>
// kernel: tpu_custom_call.1
= control target key start
LH: loop header
LB: loop body
LE: loop exit
PB: predicated region body
PF: predicated region fallthrough
CT: control target
= control target key end

     0   :  { %s4054_s0 = inlined_call_operand.hbm [shape: f32[2,4,8,24,256], index: 0, kind: input, shape index: {}]   ;;  %s4055_s1 = inlined_call_operand.hbm [shape: f32[2,8,24,256], index: 1, kind: input, shape index: {}]   ;;  %s4056_s2 = inlined_call_operand.hbm [shape: f32[2,4,8,24,256], index: 2, kind: output, shape index: {0}]   ;;  %s4057_s3 = inlined_call_operand.hbm [shape: f32[2,4,24,256], index: 3, kind: output, shape index: {1}]   ;;  %s4058_s4 = inlined_call_operand.hbm [shape: f32[2,4,24,256], index: 4, kind: output, shape index: {2}]   ;;  %s4059_s5 = inlined_call_operand.hbm [shape: f32[2,24,256], index: 5, kind: output, shape index: {3}]  }
   0x1   :  { %4101 = sst [smem:[#allocation42_spill]] %s4054_s0 }
   0x2   :  { %4102 = sst [smem:[#allocation43_spill]] %s4057_s3 }
   0x3   :  { %4103 = sst [smem:[#allocation44_spill]] %s4058_s4 }
   0x4   :  { %4104 = sst [smem:[#allocation45_spill]] %s4059_s5 }
   0x5   :  { %11 = vsyncpa [#allocation3], 0 }
   0x6   :  { %13 = vsyncpa [#allocation3 + $0x1], 0 }
   0x7   :  { %14 = vsyncpa [#allocation6], 0 }
   0x8   :  { %16 = vsyncpa [#allocation6 + $0x1], 0 }
   0x9   :  { %17 = vsyncpa [#allocation4], 0 }
   0xa   :  { %19 = vsyncpa [#allocation4 + $0x1], 0 }
   0xb   :  { %20 = vsyncpa [#allocation9], 0 }
   0xc   :  { %22 = vsyncpa [#allocation9 + $0x1], 0 }
   0xd   :  { %23 = vsyncpa [#allocation12], 0 }
   0xe   :  { %25 = vsyncpa [#allocation12 + $0x1], 0  ;;  %s2336_s18 = smov 0   ;;  %s2338_s19 = smov 0  }
   0xf   :  { %s2340_s20 = smov 0   ;;  %s2342_s21 = smov 0  }
  0x10   :  { %s2344_s22 = smov 0   ;;  %s2346_s23 = smov 0  }
  0x11   :  { %s2348_s24 = smov 0   ;;  %s2350_s25 = smov 0  }
  0x12 LB: > { %4105 = sst [smem:[#allocation18_spill]] %s2264_s18  ;;  %s2377_s26 = sadd.s32 4294967295, %s2292_s25   ;;  %s2292_s25 = sphi %s2350_s25, %s31_s25   ;;  %s2288_s24 = sphi %s2348_s24, %s4228_s24   ;;  %s2284_s23 = sphi %s2346_s23, %s4227_s23   ;;  %s2280_s22 = sphi %s2344_s22, %s4226_s22   ;;  %s2276_s21 = sphi %s2342_s21, %s4225_s21   ;;  %s2272_s20 = sphi %s2340_s20, %s4220_s20   ;;  %s2268_s19 = sphi %s2338_s19, %s4224_s19   ;;  %s2264_s18 = sphi %s2336_s18, %s4223_s18  }
  0x13   : > { %4106 = sst [smem:[#allocation19_spill]] %s2272_s20  ;;  %s4062_s27 = sadd.s32 4294967294, %s2292_s25  }
  0x14   : > { %s46_s28 = sadd.s32 1, %s2284_s23  ;;  %s50_s29 = sadd.s32 1, %s2288_s24 }
  0x15   : > { %p48_p0 = scmp.ge.s32.totalorder %s46_s28, 3  ;;  %s61_s30 = sadd.s32 1, %s2272_s20 }
  0x16   : > { %p68_p1 = scmp.ne.s32.totalorder %s2272_s20, %s2268_s19  ;;  %p69_p2 = scmp.eq.s32.totalorder %s2292_s25, 0 }
  0x17   : > { %s4230_s28 = smov (%p48_p0, %s46_s28), 0  ;;  %s4232_s29 = smov (!%p48_p0, %s50_s29), %s2288_s24 }
  0x18   : > { %4107 = sst [smem:[#allocation20_spill]] %s4230_s28  ;;  %s55_s6 = ssub.s32 %s2284_s23, %s4230_s28 }
  0x19   : > { %p2391_p3 = por %p69_p2, %p68_p1  ;;  %p52_p4 = scmp.ge.s32.totalorder %s4232_s29, 2 }
  0x1a   : > { %p74_p5 = scmp.ne.s32.totalorder %s2268_s19, %s2264_s18  ;;  %p75_p6 = scmp.eq.s32.totalorder %s2377_s26, 0 }
  0x1b   : > { %p132_p7 = scmp.eq.s32.totalorder %s2377_s26, 5  ;;  %s4234_s29 = smov (%p52_p4, %s4232_s29), 0 }
  0x1c   : > { %4109 = sst [smem:[#allocation21_spill]] %s4234_s29  ;;  %p2401_p8 = por %p75_p6, %p74_p5 }
  0x1d   : > { %p2405_p9 = por %p132_p7, %p68_p1  ;;  %s54_s10 = ssub.s32 %s2288_s24, %s4234_s29 }
  0x1e   : > { %p138_p10 = scmp.eq.s32.totalorder %s4062_s27, 5  ;;  %s56_s11 = sor.u32 %s55_s6, %s54_s10 }
  0x1f   : > { %p59_p11 = scmp.eq.s32.totalorder %s56_s11, 0  ;;  %p1818_p13 = scmp.lt.s32.totalorder %s2292_s25, 6 }
  0x20   : > { %p2413_p12 = por %p138_p10, %p74_p5  ;;  %s2419_s13 = sand.u32 1, %s2272_s20  }
  0x21   : > { %s2422_s14 = scalar_select %p59_p11, %s2272_s20, %s61_s30  }
  0x22   : > { %s4112_s12 = scalar_select %p2413_p12, 1, 0 }
  0x23   : > { %4114 = sst [smem:[#allocation23_spill]] %s2422_s14  ;;  %s1643_s15 = sshll.u32 %s2419_s13, 9 }
  0x24   : > { %4113 = sst [smem:[#allocation22_spill]] %s4112_s12  ;;  %s1644_s16 = sshll.u32 %s2284_s23, 1 }
  0x25   : > { %s1780_s17 = smul.u32 192, %s2288_s24  ;;  %s252_s29 = scalar_lea.vmem [#allocation2], %s1643_s15 }
  0x26   : > { %s263_s28 = sshll.u32 %s252_s29, 4  ;;  %p2429_p0 = pnand %p1818_p13, %p2391_p3  ;;  %s264_s28 = int_to_ptr.vmem [resolvable:$true] %s263_s28 }
  0x27   : > { %s260_s10 = sadd.s32 %s1780_s17, %s1644_s16  ;;  %s4116_s0 = sld [smem:[#allocation42_spill]] }
  0x28   : > { %s1645_s11 = sshll.u32 %s260_s10, 7  ;;  %p1649_p1 = scmp.ge.s32.totalorder %s2292_s25, 1 }
  0x29   : > { %s249_s14 = scalar_lea.sflag [#allocation3], %s2419_s13  ;;  %p2052_p2 = pneg %p2429_p0 }
  0x2a   : > { %s2063_s29 = scalar_lea.vmem %s264_s28, 8192  ;;  %s2294_s7 = smov [#allocation2]  }
  0x2b   : > { %p2064_p4 = scmp.ne.s32.totalorder %s264_s28, %s2063_s29  ;;  %s2068_s15 = sshll.u32 %s2294_s7, 4  ;;  %s2069_s15 = int_to_ptr.vmem [resolvable:$false] %s2068_s15 }
  0x2c   : > { %s2070_s20 = scalar_lea.vmem %s2069_s15, 16384  ;;  %p2071_p6 = scmp.lt.s32.totalorder %s264_s28, %s2069_s15 }
  0x2d   : > { %s262_s30 = scalar_lea.hbm %s4116_s0, %s1645_s11  ;;  %p2066_p3 = pnand %p2064_p4, %p2052_p2 }
  0x2e   : > { %p2072_p7 = scmp.lt.s32.totalorder %s2070_s20, %s2063_s29 }
  0x2f   : > { %p2067_p5 = pneg %p2066_p3 }
  0x30   : > { %p2073_p10 = por %p2072_p7, %p2071_p6 }
  0x32   : > { %p2074_p11 = pnand %p2073_p10, %p2067_p5 }
  0x34   : > { %2077 = shalt.err (!%p2074_p11)
}
  0x35   : > { %s4069_s27 = smov 768   ;;  %s2296_s12 = smov 256  }
  0x36   : > { %s2297_s17 = smov 16   ;;  %p296_p13 = scmp.lt.s32.totalorder %s2292_s25, 7 }
  0x37   : > { %1801 = dma.hbm_to_vmem [thread:$0]  (!%p2429_p0), %s262_s30, 8192, %s264_s28, %s249_s14, %s4069_s27, %s2296_s12, %s2297_s17  }
  0x38   : > { %s1646_s20 = sshll.u32 %s2419_s13, 7  ;;  %s1781_s10 = smul.u32 48, %s2288_s24 }
  0x39   : > { %p2455_p4 = pnand %p1649_p1, %p296_p13  ;;  %s277_s7 = scalar_lea.vmem [#allocation5], %s1646_s20 }
  0x3a   : > { %s285_s29 = sadd.s32 %s1781_s10, %s1644_s16  ;;  %s288_s15 = sshll.u32 %s277_s7, 4  ;;  %s289_s15 = int_to_ptr.vmem [resolvable:$true] %s288_s15 }
  0x3b   : > { %s1648_s0 = sshll.u32 %s285_s29, 7  ;;  %s274_s3 = scalar_lea.sflag [#allocation6], %s2419_s13 }
  0x3c   : > { %s287_s4 = scalar_lea.hbm %s4055_s1, %s1648_s0  ;;  %s2091_s28 = scalar_lea.vmem %s289_s15, 2048 }
  0x3d   : > { %p2092_p3 = scmp.ne.s32.totalorder %s289_s15, %s2091_s28  ;;  %s2298_s14 = smov [#allocation5]  }
  0x3e   : > { %s2096_s30 = sshll.u32 %s2298_s14, 4  ;;  %s2097_s30 = int_to_ptr.vmem [resolvable:$false] %s2096_s30 }
  0x3f   : > { %p2094_p5 = pnand %p2092_p3, %p2052_p2  ;;  %s2098_s27 = scalar_lea.vmem %s2097_s30, 4096 }
  0x40   : > { %p2099_p6 = scmp.lt.s32.totalorder %s289_s15, %s2097_s30  ;;  %p2100_p7 = scmp.lt.s32.totalorder %s2098_s27, %s2091_s28 }
  0x41   : > { %p2095_p1 = pneg %p2094_p5 }
  0x42   : > { %p2101_p10 = por %p2100_p7, %p2099_p6 }
  0x44   : > { %p2102_p11 = pnand %p2101_p10, %p2095_p1 }
  0x46   : > { %2105 = shalt.err (!%p2102_p11)
}
  0x47   : > { %s4118_s0 = smov 768   ;;  %300 = sbr.rel (%p2455_p4) target bundleno = 389 (0x185), region = 28 }
  0x48   : > { %1804 = dma.hbm_to_vmem [thread:$0]  (!%p2429_p0), %s287_s4, 2048, %s289_s15, %s274_s3, %s4118_s0, %s2296_s12, %s2297_s17  }
  0x4c   : > { %s2476_s5 = sand.u32 1, %s2268_s19  }
  0x4d   : > { %s1650_s18 = sshll.u32 %s2476_s5, 9  ;;  %s303_s13 = scalar_lea.sflag [#allocation3], %s2476_s5 }
  0x4e   : > { %s2482_s16 = scalar_lea.vmem [#allocation2], %s1650_s18 }
  0x4f   : > { %2243 = dma.done.wait (%p2401_p8), %s303_s13, 8192  }
  0x50   : > { %2245 = vsyncadd (%p2401_p8), %s303_s13, 4294959104  ;;  %s1651_s3 = sshll.u32 %s2476_s5, 7  ;;  %s312_s4 = scalar_lea.sflag [#allocation6], %s2476_s5 }
  0x51   : > { %s2490_s6 = scalar_lea.vmem [#allocation5], %s1651_s3 }
  0x52   : > { %2247 = dma.done.wait (%p2401_p8), %s312_s4, 2048  }
  0x53   : > { %2249 = vsyncadd (%p2401_p8), %s312_s4, 4294965248  ;;  %v384_v0 = vld [vmem:[%s2482_s16] sm:$0xff]  ;;  %v386_v1 = vld [vmem:[%s2482_s16 + $0x10] sm:$0xff]  ;;  %s2904_s8 = scalar_lea.vmem [#allocation7], %s1650_s18  ;;  %s1653_s27 = sshll.u32 %s2476_s5, 6 }
  0x54   : > { %v388_v2 = vld [vmem:[%s2482_s16 + $0x20] sm:$0xff]  ;;  %v390_v3 = vld [vmem:[%s2482_s16 + $0x30] sm:$0xff]  ;;  %v2505_v14 = vld [vmem:[%s2482_s16 + $0x8] sm:$0xff]  ;;  %s2998_s12 = scalar_lea.vmem [#allocation8], %s1653_s27  ;;  %s1782_s17 = smul.u32 192, %s2280_s22 }
  0x55   : > { %v392_v4 = vld [vmem:[%s2482_s16 + $0x40] sm:$0xff]  ;;  %v394_v5 = vld [vmem:[%s2482_s16 + $0x50] sm:$0xff]  ;;  %v400_v6 = vmax.f32 %v384_v0, %v388_v2  ;;  %v401_v7 = vmax.f32 %v386_v1, %v390_v3  ;;  %v2508_v15 = vld [vmem:[%s2482_s16 + $0x18] sm:$0xff]  ;;  %s3436_s20 = sshll.u32 %s2276_s21, 1  ;;  %s1348_s11 = sshll.u32 %s2904_s8, 4  ;;  %s3568_s11 = int_to_ptr.vmem [resolvable:$true] %s1348_s11 }
  0x56   : > { %v396_v8 = vld [vmem:[%s2482_s16 + $0x60] sm:$0xff]  ;;  %v398_v9 = vld [vmem:[%s2482_s16 + $0x70] sm:$0xff]  ;;  %v2511_v16 = vld [vmem:[%s2482_s16 + $0x28] sm:$0xff]  ;;  %s3468_s21 = sadd.s32 %s1782_s17, %s3436_s20  ;;  %s1316_s28 = scalar_lea.sflag [#allocation4], %s2476_s5 }
  0x57   : > { %v402_v10 = vmax.f32 %v400_v6, %v392_v4  ;;  %v403_v11 = vmax.f32 %v401_v7, %v394_v5  ;;  %v2514_v17 = vld [vmem:[%s2482_s16 + $0x38] sm:$0xff]  ;;  %v2517_v18 = vld [vmem:[%s2482_s16 + $0x48] sm:$0xff]  ;;  %v407_v19 = vmax.f32 %v2505_v14, %v2511_v16  ;;  %v2534_v30 = vld [vmem:[%s2482_s16 + $0x80] sm:$0xff]  ;;  %s1771_s10 = sshll.u32 %s3468_s21, 7  ;;  %s2106_s14 = scalar_lea.vmem %s3568_s11, 8192 }
  0x58   : > { %v408_v21 = vmax.f32 %v2508_v15, %v2514_v17  ;;  %v2524_v22 = vld [vmem:[%s2482_s16 + $0x58] sm:$0xff]  ;;  %v2528_v28 = vld [vmem:[%s2482_s16 + $0x68] sm:$0xff]  ;;  %v2537_v35 = vld [vmem:[%s2482_s16 + $0x90] sm:$0xff]  ;;  %s3540_s15 = scalar_lea.hbm %s4056_s2, %s1771_s10  ;;  %p2107_p8 = scmp.ne.s32.totalorder %s3568_s11, %s2106_s14 }
  0x59   : > { %v404_v12 = vmax.f32 %v402_v10, %v396_v8  ;;  %v405_v13 = vmax.f32 %v403_v11, %v398_v9  ;;  %v409_v23 = vmax.f32 %v407_v19, %v2517_v18  ;;  %v2531_v29 = vld [vmem:[%s2482_s16 + $0x78] sm:$0xff]  ;;  %v2540_v36 = vld [vmem:[%s2482_s16 + $0xa0] sm:$0xff]  ;;  %v2543_v37 = vld [vmem:[%s2482_s16 + $0xb0] sm:$0xff]  ;;  %s2299_s30 = smov [#allocation7]  }
  0x5a   : > { %v410_v41 = vmax.f32 %v408_v21, %v2524_v22  ;;  %v2548_v44 = vld [vmem:[%s2482_s16 + $0xc0] sm:$0xff]  ;;  %v2551_v45 = vld [vmem:[%s2482_s16 + $0x88] sm:$0xff]  ;;  %v2555_v48 = vld [vmem:[%s2482_s16 + $0x98] sm:$0xff]  ;;  %v561_v52 = vmax.f32 %v2534_v30, %v2540_v36  ;;  %v562_v53 = vmax.f32 %v2537_v35, %v2543_v37  ;;  %p2108_p0 = pnand %p2107_p8, %p2405_p9  ;;  %s2110_s0 = sshll.u32 %s2299_s30, 4  ;;  %s2111_s0 = int_to_ptr.vmem [resolvable:$false] %s2110_s0 }
  0x5b   : > { %v406_v20 = vmax.f32 %v404_v12, %v405_v13  ;;  %v411_v43 = vmax.f32 %v409_v23, %v2528_v28  ;;  %v2558_v49 = vld [vmem:[%s2482_s16 + $0xa8] sm:$0xff]  ;;  %v2561_v50 = vld [vmem:[%s2482_s16 + $0xb8] sm:$0xff]  ;;  %v2568_v57 = vld [vmem:[%s2482_s16 + $0xd0] sm:$0xff]  ;;  %s2112_s18 = scalar_lea.vmem %s2111_s0, 16384  ;;  %p2113_p13 = scmp.lt.s32.totalorder %s3568_s11, %s2111_s0 }
  0x5c   : > { %v412_v47 = vmax.f32 %v410_v41, %v2531_v29  ;;  %v563_v58 = vmax.f32 %v561_v52, %v2548_v44  ;;  %v568_v59 = vmax.f32 %v2551_v45, %v2558_v49  ;;  %v569_v60 = vmax.f32 %v2555_v48, %v2561_v50  ;;  %v2587_v7 = vld [vmem:[%s2482_s16 + $0xe0] sm:$0xff]  ;;  %v2603_v19 = vld [vmem:[%s2482_s16 + $0xf8] sm:$0xff]  ;;  %p2109_p2 = pneg %p2108_p0  ;;  %p2114_p4 = scmp.lt.s32.totalorder %s2112_s18, %s2106_s14 }
  0x5d   : > { %v414_v24 = vsub.f32 %v384_v0, %v406_v20  ;;  %v416_v25 = vsub.f32 %v386_v1, %v406_v20  ;;  %v418_v26 = vsub.f32 %v388_v2, %v406_v20  ;;  %v420_v27 = vsub.f32 %v390_v3, %v406_v20  ;;  %v2582_v3 = vld [vmem:[%s2482_s16 + $0xc8] sm:$0xff] }
  0x5e   : > { %v422_v31 = vsub.f32 %v392_v4, %v406_v20  ;;  %v424_v32 = vsub.f32 %v394_v5, %v406_v20  ;;  %v426_v33 = vsub.f32 %v396_v8, %v406_v20  ;;  %v428_v34 = vsub.f32 %v398_v9, %v406_v20  ;;  %v2590_v8 = vld [vmem:[%s2482_s16 + $0xf0] sm:$0xff]  ;;  %v2593_v9 = vld [vmem:[%s2482_s16 + $0xd8] sm:$0xff]  ;;  %p2115_p3 = por %p2114_p4, %p2113_p13 }
  0x5f   : > { %v430_v38 = vmul.f32 1.442695, %v414_v24  ;;  %v434_v39 = vmul.f32 1.442695, %v416_v25  ;;  %v438_v40 = vmul.f32 1.442695, %v418_v26  ;;  %v413_v56 = vmax.f32 %v411_v43, %v412_v47 }
  0x60   : > { %v442_v42 = vmul.f32 1.442695, %v420_v27  ;;  %v446_v46 = vmul.f32 1.442695, %v422_v31  ;;  %v450_v51 = vmul.f32 1.442695, %v424_v32  ;;  %v564_v2 = vmax.f32 %v562_v53, %v2568_v57  ;;  %p2116_p5 = pnand %p2115_p3, %p2109_p2 }
  0x61   : > { %1890 = vpow2.f32 %v430_v38  ;;  %v454_v54 = vmul.f32 1.442695, %v426_v33  ;;  %v458_v55 = vmul.f32 1.442695, %v428_v34  ;;  %v415_v61 = vsub.f32 %v2505_v14, %v413_v56  ;;  %v2609_v27 = vld [vmem:[%s2482_s16 + $0x100] sm:$0xff] }
  0x62   : > { %1892 = vpow2.f32 %v434_v39  ;;  %v417_v62 = vsub.f32 %v2508_v15, %v413_v56  ;;  %v419_v63 = vsub.f32 %v2511_v16, %v413_v56  ;;  %v421_v0 = vsub.f32 %v2514_v17, %v413_v56 }
  0x63   : > { %1894 = vpow2.f32 %v438_v40  ;;  %v423_v1 = vsub.f32 %v2517_v18, %v413_v56  ;;  %v425_v4 = vsub.f32 %v2524_v22, %v413_v56  ;;  %v427_v5 = vsub.f32 %v2528_v28, %v413_v56  ;;  %v2600_v18 = vld [vmem:[%s2482_s16 + $0xe8] sm:$0xff]  ;;  %v2612_v28 = vld [vmem:[%s2482_s16 + $0x120] sm:$0xff] }
  0x64   : > { %1896 = vpow2.f32 %v442_v42  ;;  %v432_v6 = vmul.f32 1.442695, %v415_v61  ;;  %v436_v10 = vmul.f32 1.442695, %v417_v62  ;;  %v440_v11 = vmul.f32 1.442695, %v419_v63 }
  0x65   : > { %1898 = vpow2.f32 %v446_v46  ;;  %v444_v12 = vmul.f32 1.442695, %v421_v0  ;;  %v429_v13 = vsub.f32 %v2531_v29, %v413_v56  ;;  %v570_v14 = vmax.f32 %v568_v59, %v2582_v3  ;;  %v2650_v56 = vld [vmem:[%s2482_s16 + $0x128] sm:$0xff] }
  0x66   : > { %1900 = vpow2.f32 %v450_v51  ;;  %v448_v15 = vmul.f32 1.442695, %v423_v1  ;;  %v565_v16 = vmax.f32 %v563_v58, %v2587_v7  ;;  %v566_v17 = vmax.f32 %v564_v2, %v2590_v8  ;;  %v2664_v1 = vld [vmem:[%s2482_s16 + $0x118] sm:$0xff] }
  0x67   : > { %1902 = vpow2.f32 %v454_v54  ;;  %v452_v20 = vmul.f32 1.442695, %v425_v4  ;;  %v571_v21 = vmax.f32 %v569_v60, %v2593_v9  ;;  %v456_v22 = vmul.f32 1.442695, %v427_v5  ;;  %v2644_v54 = vld [vmem:[%s2482_s16 + $0x140] sm:$0xff]  ;;  %v2667_v2 = vld [vmem:[%s2482_s16 + $0x138] sm:$0xff] }
  0x68   : > { %1904 = vpow2.f32 %v458_v55  ;;  %v567_v23 = vmax.f32 %v565_v16, %v566_v17  ;;  %v460_v24 = vmul.f32 1.442695, %v429_v13  ;;  %v572_v25 = vmax.f32 %v570_v14, %v2600_v18  ;;  %v2647_v55 = vld [vmem:[%s2482_s16 + $0x108] sm:$0xff] }
  0x69   : > { %1906 = vpow2.f32 %v432_v6  ;;  %v573_v26 = vmax.f32 %v571_v21, %v2603_v19  ;;  %v731_v6 = vmax.f32 %v2647_v55, %v2650_v56 }
  0x6a   : > { %1908 = vpow2.f32 %v436_v10  ;;  %v575_v31 = vsub.f32 %v2534_v30, %v567_v23  ;;  %v577_v32 = vsub.f32 %v2537_v35, %v567_v23  ;;  %v579_v33 = vsub.f32 %v2540_v36, %v567_v23  ;;  %v2628_v30 = vld [vmem:[%s2482_s16 + $0x110] sm:$0xff] }
  0x6b   : > { %1910 = vpow2.f32 %v440_v11  ;;  %v581_v38 = vsub.f32 %v2543_v37, %v567_v23  ;;  %v583_v41 = vsub.f32 %v2548_v44, %v567_v23  ;;  %v2631_v35 = vld [vmem:[%s2482_s16 + $0x130] sm:$0xff]  ;;  %v724_v36 = vmax.f32 %v2609_v27, %v2612_v28 }
  0x6c   : > { %1912 = vpow2.f32 %v444_v12  ;;  %v591_v37 = vmul.f32 1.442695, %v575_v31  ;;  %v595_v43 = vmul.f32 1.442695, %v577_v32  ;;  %v599_v46 = vmul.f32 1.442695, %v579_v33 }
  0x6d   : > { %1914 = vpow2.f32 %v448_v15  ;;  %v2637_v47 = vmax.f32 %v572_v25, %v573_v26  ;;  %v585_v44 = vsub.f32 %v2568_v57, %v567_v23  ;;  %v603_v53 = vmul.f32 1.442695, %v581_v38  ;;  %v2710_v33 = vld [vmem:[%s2482_s16 + $0x158] sm:$0xff] }
  0x6e   : > { %v2614_v29 = vpop.eup %1890  ;;  %1916 = vpow2.f32 %v452_v20  ;;  %v587_v59 = vsub.f32 %v2587_v7, %v567_v23  ;;  %v589_v60 = vsub.f32 %v2590_v8, %v567_v23  ;;  %v607_v63 = vmul.f32 1.442695, %v583_v41  ;;  %v2697_v23 = vld [vmem:[%s2482_s16 + $0x148] sm:$0xff] }
  0x6f   : > { %v2619_v34 = vpop.eup %1892  ;;  %1918 = vpow2.f32 %v456_v22  ;;  %v576_v61 = vsub.f32 %v2551_v45, %v2637_v47  ;;  %v578_v0 = vsub.f32 %v2555_v48, %v2637_v47  ;;  %v725_v5 = vmax.f32 %v2628_v30, %v2631_v35  ;;  %v2694_v22 = vld [vmem:[%s2482_s16 + $0x160] sm:$0xff] }
  0x70   : > { %v2622_v39 = vpop.eup %1894  ;;  %v462_v40 = vadd.f32 %v2619_v34, %v2614_v29  ;;  %1920 = vpow2.f32 %v460_v24  ;;  %v726_v45 = vmax.f32 %v724_v36, %v2644_v54  ;;  %v611_v8 = vmul.f32 1.442695, %v585_v44  ;;  %v2730_v44 = vld [vmem:[%s2482_s16 + $0x178] sm:$0xff] }
  0x71   : > { %v2635_v42 = vpop.eup %1896  ;;  %1922 = vpow2.f32 %v591_v37  ;;  %v580_v10 = vsub.f32 %v2558_v49, %v2637_v47  ;;  %v615_v12 = vmul.f32 1.442695, %v587_v59  ;;  %v619_v13 = vmul.f32 1.442695, %v589_v60  ;;  %v2691_v49 = vld [vmem:[%s2482_s16 + $0x150] sm:$0xff] }
  0x72   : > { %v2639_v51 = vpop.eup %1898  ;;  %v463_v52 = vadd.f32 %v2622_v39, %v462_v40  ;;  %1924 = vpow2.f32 %v595_v43  ;;  %v593_v14 = vmul.f32 1.442695, %v576_v61  ;;  %v732_v15 = vmax.f32 %v2664_v1, %v2667_v2 }
  0x73   : > { %v2652_v58 = vpop.eup %1900  ;;  %1926 = vpow2.f32 %v599_v46  ;;  %v597_v21 = vmul.f32 1.442695, %v578_v0  ;;  %v582_v25 = vsub.f32 %v2561_v50, %v2637_v47  ;;  %v584_v26 = vsub.f32 %v2582_v3, %v2637_v47  ;;  %v2715_v50 = vld [vmem:[%s2482_s16 + $0x170] sm:$0xff] }
  0x74   : > { %v2658_v62 = vpop.eup %1902  ;;  %v464_v57 = vadd.f32 %v2635_v42, %v463_v52  ;;  %1928 = vpow2.f32 %v603_v53  ;;  %v586_v31 = vsub.f32 %v2593_v9, %v2637_v47  ;;  %v588_v32 = vsub.f32 %v2600_v18, %v2637_v47  ;;  %v2727_v52 = vld [vmem:[%s2482_s16 + $0x168] sm:$0xff] }
  0x75   : > { %v2669_v4 = vpop.eup %1904  ;;  %1930 = vpow2.f32 %v607_v63  ;;  %v601_v41 = vmul.f32 1.442695, %v580_v10  ;;  %v727_v3 = vmax.f32 %v725_v5, %v2691_v49  ;;  %v728_v9 = vmax.f32 %v726_v45, %v2694_v22  ;;  %v2744_v10 = vld [vmem:[%s2482_s16 + $0x180] sm:$0xff] }
  0x76   : > { %v2676_v7 = vpop.eup %1906  ;;  %v465_v48 = vadd.f32 %v2639_v51, %v464_v57  ;;  %1932 = vpow2.f32 %v611_v8  ;;  %v733_v18 = vmax.f32 %v731_v6, %v2697_v23  ;;  %v734_v53 = vmax.f32 %v732_v15, %v2710_v33  ;;  %v2753_v15 = vld [vmem:[%s2482_s16 + $0x190] sm:$0xff] }
  0x77   : > { %v2681_v11 = vpop.eup %1908  ;;  %1934 = vpow2.f32 %v593_v14  ;;  %v590_v60 = vsub.f32 %v2603_v19, %v2637_v47  ;;  %v605_v61 = vmul.f32 1.442695, %v582_v25  ;;  %v729_v57 = vmax.f32 %v727_v3, %v2715_v50  ;;  %v2747_v19 = vld [vmem:[%s2482_s16 + $0x1a0] sm:$0xff] }
  0x78   : > { %v2685_v16 = vpop.eup %1910  ;;  %v466_v17 = vadd.f32 %v2652_v58, %v465_v48  ;;  %v469_v20 = vadd.f32 %v2681_v11, %v2676_v7  ;;  %1936 = vpow2.f32 %v597_v21  ;;  %v609_v0 = vmul.f32 1.442695, %v584_v26 }
  0x79   : > { %v2699_v24 = vpop.eup %1912  ;;  %1938 = vpow2.f32 %v615_v12  ;;  %v613_v5 = vmul.f32 1.442695, %v586_v31  ;;  %v730_v6 = vmax.f32 %v728_v9, %v729_v57  ;;  %v735_v48 = vmax.f32 %v733_v18, %v2727_v52  ;;  %v2787_v57 = vld [vmem:[%s2482_s16 + $0x1d0] sm:$0xff] }
  0x7a   : > { %v467_v38 = vadd.f32 %v2658_v62, %v466_v17  ;;  %v470_v40 = vadd.f32 %v2685_v16, %v469_v20  ;;  %v2717_v36 = vpop.eup %1914  ;;  %v736_v8 = vmax.f32 %v734_v53, %v2730_v44  ;;  %v617_v14 = vmul.f32 1.442695, %v588_v32  ;;  %v2756_v17 = vld [vmem:[%s2482_s16 + $0x1b0] sm:$0xff] }
  0x7b   : > { %v2722_v37 = vpop.eup %1916  ;;  %v621_v20 = vmul.f32 1.442695, %v590_v60  ;;  %v738_v21 = vsub.f32 %v2609_v27, %v730_v6  ;;  %v740_v25 = vsub.f32 %v2628_v30, %v730_v6  ;;  %v742_v27 = vsub.f32 %v2612_v28, %v730_v6 }
  0x7c   : > { %v468_v43 = vadd.f32 %v2669_v4, %v467_v38  ;;  %v471_v46 = vadd.f32 %v2699_v24, %v470_v40  ;;  %v2733_v59 = vpop.eup %1918  ;;  %v887_v38 = vmax.f32 %v2744_v10, %v2747_v19  ;;  %v888_v30 = vmax.f32 %v2753_v15, %v2756_v17 }
  0x7d   : > { %v2739_v45 = vpop.eup %1920  ;;  %v744_v18 = vsub.f32 %v2631_v35, %v730_v6  ;;  %v746_v60 = vsub.f32 %v2644_v54, %v730_v6  ;;  %v748_v28 = vsub.f32 %v2691_v49, %v730_v6  ;;  %v752_v35 = vsub.f32 %v2715_v50, %v730_v6 }
  0x7e   : > { %1940 = vrcp.f32 %v468_v43  ;;  %v472_v63 = vadd.f32 %v2717_v36, %v471_v46  ;;  %v2749_v47 = vpop.eup %1922  ;;  %v754_v43 = vmul.f32 1.442695, %v738_v21  ;;  %v2780_v46 = vld [vmem:[%s2482_s16 + $0x1c0] sm:$0xff] }
  0x7f   : > { %1942 = vpow2.f32 %v619_v13  ;;  %v2758_v13 = vpop.eup %1924 }
  0x80   : > { %v473_v12 = vadd.f32 %v2722_v37, %v472_v63  ;;  %1944 = vpow2.f32 %v601_v41  ;;  %v2762_v26 = vpop.eup %1926  ;;  %v623_v32 = vadd.f32 %v2758_v13, %v2749_v47  ;;  %v2772_v41 = vmax.f32 %v735_v48, %v736_v8 }
  0x81   : > { %1946 = vpow2.f32 %v605_v61  ;;  %v2769_v40 = vpop.eup %1928  ;;  %v758_v61 = vmul.f32 1.442695, %v740_v25  ;;  %v762_v48 = vmul.f32 1.442695, %v742_v27  ;;  %v2795_v8 = vmax.f32 %v887_v38, %v2780_v46 }
  0x82   : > { %v474_v31 = vadd.f32 %v2733_v59, %v473_v12  ;;  %1948 = vpow2.f32 %v609_v0  ;;  %4119 = vst [vmem:[#allocation24_spill] sm:$0xff] %v2769_v40  ;;  %v624_v9 = vadd.f32 %v2762_v26, %v623_v32  ;;  %v2782_v53 = vpop.eup %1930  ;;  %v750_v0 = vsub.f32 %v2694_v22, %v730_v6 }
  0x83   : > { %1950 = vpow2.f32 %v613_v5  ;;  %4120 = vst [vmem:[#allocation25_spill] sm:$0xff] %v2782_v53  ;;  %v2792_v5 = vpop.eup %1932  ;;  %v766_v12 = vmul.f32 1.442695, %v744_v18  ;;  %v2801_v22 = vmax.f32 %v888_v30, %v2787_v57  ;;  %v770_v6 = vmul.f32 1.442695, %v746_v60  ;;  %v2814_v30 = vld [vmem:[%s2490_s6] sm:$0xff] }
  0x84   : > { %v475_v3 = vadd.f32 %v2739_v45, %v474_v31  ;;  %1952 = vpow2.f32 %v617_v14  ;;  %v625_v63 = vadd.f32 %v2769_v40, %v624_v9  ;;  %4121 = vst [vmem:[#allocation26_spill] sm:$0xff] %v2792_v5  ;;  %v2797_v54 = vpop.eup %1934  ;;  %v774_v14 = vmul.f32 1.442695, %v748_v28  ;;  %4124 = vst [vmem:[#allocation29_spill] sm:$0xff] %v2814_v30  ;;  %v2820_v9 = vld [vmem:[%s2490_s6 + $0x20] sm:$0xff] }
  0x85   : > { %4122 = vst [vmem:[#allocation27_spill] sm:$0xff] %v2797_v54  ;;  %v2803_v50 = vpop.eup %1936  ;;  %v778_v25 = vmul.f32 1.442695, %v750_v0  ;;  %v782_v31 = vmul.f32 1.442695, %v752_v35  ;;  %v741_v32 = vsub.f32 %v2664_v1, %v2772_v41  ;;  %v743_v38 = vsub.f32 %v2650_v56, %v2772_v41  ;;  %4126 = vst [vmem:[#allocation31_spill] sm:$0xff] %v2820_v9 }
  0x86   : > { %1954 = vrcp.f32 %v475_v3  ;;  %v626_v49 = vadd.f32 %v2782_v53, %v625_v63  ;;  %4123 = vst [vmem:[#allocation28_spill] sm:$0xff] %v2803_v50  ;;  %v2807_v21 = vpop.eup %1938  ;;  %v2817_v3 = vld [vmem:[%s2490_s6 + $0x10] sm:$0xff]  ;;  %v630_v18 = vadd.f32 %v2803_v50, %v2797_v54 }
  0x87   : > { %1956 = vpow2.f32 %v621_v20  ;;  %v739_v20 = vsub.f32 %v2647_v55, %v2772_v41  ;;  %4125 = vst [vmem:[#allocation30_spill] sm:$0xff] %v2817_v3  ;;  %v2836_v0 = vld [vmem:[%s2490_s6 + $0x30] sm:$0xff] }
  0x88   : > { %1958 = vpow2.f32 %v754_v43  ;;  %v627_v55 = vadd.f32 %v2792_v5, %v626_v49  ;;  %4128 = vst [vmem:[#allocation33_spill] sm:$0xff] %v2836_v0 }
  0x89   : > { %1960 = vpow2.f32 %v758_v61  ;;  %v2860_v54 = vmul.f32 1.442695, %v739_v20  ;;  %v2873_v20 = vmul.f32 1.442695, %v743_v38 }
  0x8a   : > { %1962 = vpow2.f32 %v762_v48  ;;  %v628_v5 = vadd.f32 %v2807_v21, %v627_v55 }
  0x8b   : > { %v1941_v27 = vpop.eup %1940  ;;  %1964 = vpow2.f32 %v766_v12  ;;  %v2855_v12 = vld [vmem:[%s2490_s6 + $0x50] sm:$0xff] }
  0x8c   : > { %v2827_v43 = vpop.eup %1942  ;;  %v480_v56 = vmul.f32 %v1941_v27, %v2614_v29  ;;  %v482_v60 = vmul.f32 %v1941_v27, %v2619_v34  ;;  %v484_v28 = vmul.f32 %v1941_v27, %v2622_v39  ;;  %v486_v61 = vmul.f32 %v1941_v27, %v2635_v42  ;;  %4129 = vst [vmem:[#allocation34_spill] sm:$0xff] %v2855_v12 }
  0x8d   : > { %v2833_v63 = vpop.eup %1944  ;;  %v488_v35 = vmul.f32 %v1941_v27, %v2639_v51  ;;  %v490_v39 = vmul.f32 %v1941_v27, %v2652_v58  ;;  %v2852_v51 = vld [vmem:[%s2490_s6 + $0x40] sm:$0xff]  ;;  %v492_v48 = vmul.f32 %v1941_v27, %v2658_v62  ;;  %1966 = vpow2.f32 %v770_v6 }
  0x8e   : > { %4127 = vst [vmem:[#allocation32_spill] sm:$0xff] %v2833_v63  ;;  %v2843_v34 = vpop.eup %1946  ;;  %v512_v42 = vmul.f32 %v480_v56, %v2814_v30  ;;  %v514_v49 = vmul.f32 %v482_v60, %v2817_v3  ;;  %v516_v1 = vmul.f32 %v484_v28, %v2820_v9  ;;  %v2865_v30 = vld [vmem:[%s2490_s6 + $0x60] sm:$0xff]  ;;  %v518_v9 = vmul.f32 %v486_v61, %v2836_v0 }
  0x8f   : > { %v2849_v50 = vpop.eup %1948  ;;  %4130 = vst [vmem:[#allocation35_spill] sm:$0xff] %v2865_v30  ;;  %v631_v53 = vadd.f32 %v2833_v63, %v630_v18  ;;  %v494_v62 = vmul.f32 %v1941_v27, %v2669_v4  ;;  %1968 = vpow2.f32 %v774_v14  ;;  %v2871_v6 = vmul.f32 1.442695, %v741_v32  ;;  %v2881_v14 = vld [vmem:[%s2490_s6 + $0x8] sm:$0xff]  ;;  %v2884_v32 = vld [vmem:[%s2490_s6 + $0x18] sm:$0xff]  ;;  %496 = vst [vmem:[%s2904_s8] sm:$0xff] %v480_v56 }
  0x90   : > { %v2862_v58 = vpop.eup %1950  ;;  %v528_v3 = vadd.f32 %v514_v49, %v512_v42  ;;  %v520_v40 = vmul.f32 %v488_v35, %v2852_v51  ;;  %v522_v0 = vmul.f32 %v490_v39, %v2855_v12  ;;  %1970 = vpow2.f32 %v778_v25  ;;  %v2891_v49 = vld [vmem:[%s2490_s6 + $0x70] sm:$0xff]  ;;  %v2894_v25 = vld [vmem:[%s2490_s6 + $0x28] sm:$0xff]  ;;  %v2900_v12 = vld [vmem:[%s2482_s16 + $0x1e0] sm:$0xff]  ;;  %498 = vst [vmem:[%s2904_s8 + $0x10] sm:$0xff] %v482_v60 }
  0x91   : > { %v2875_v29 = vpop.eup %1952  ;;  %v524_v4 = vmul.f32 %v492_v48, %v2865_v30  ;;  %v629_v38 = vadd.f32 %v2827_v43, %v628_v5  ;;  %v632_v27 = vadd.f32 %v2843_v34, %v631_v53  ;;  %1972 = vpow2.f32 %v782_v31  ;;  %500 = vst [vmem:[%s2904_s8 + $0x20] sm:$0xff] %v484_v28  ;;  %502 = vst [vmem:[%s2904_s8 + $0x30] sm:$0xff] %v486_v61 }
  0x92   : > { %v529_v42 = vadd.f32 %v528_v3, %v516_v1  ;;  %504 = vst [vmem:[%s2904_s8 + $0x40] sm:$0xff] %v488_v35  ;;  %506 = vst [vmem:[%s2904_s8 + $0x50] sm:$0xff] %v490_v39  ;;  %v891_v35 = vmax.f32 %v2795_v8, %v2900_v12 }
  0x93   : > { %v1955_v55 = vpop.eup %1954  ;;  %508 = vst [vmem:[%s2904_s8 + $0x60] sm:$0xff] %v492_v48  ;;  %510 = vst [vmem:[%s2904_s8 + $0x70] sm:$0xff] %v494_v62  ;;  %1974 = vrcp.f32 %v629_v38  ;;  %v633_v8 = vadd.f32 %v2849_v50, %v632_v27 }
  0x94   : > { %v2888_v18 = vpop.eup %1956  ;;  %v530_v3 = vadd.f32 %v529_v42, %v518_v9  ;;  %v481_v1 = vmul.f32 %v1955_v55, %v2676_v7  ;;  %v483_v63 = vmul.f32 %v1955_v55, %v2681_v11  ;;  %v485_v30 = vmul.f32 %v1955_v55, %v2685_v16  ;;  %v2917_v11 = vld [vmem:[%s2490_s6 + $0x38] sm:$0xff] }
  0x95   : > { %v2914_v7 = vpop.eup %1958  ;;  %v487_v16 = vmul.f32 %v1955_v55, %v2699_v24  ;;  %v489_v53 = vmul.f32 %v1955_v55, %v2717_v36  ;;  %v491_v5 = vmul.f32 %v1955_v55, %v2722_v37  ;;  %v493_v31 = vmul.f32 %v1955_v55, %v2733_v59  ;;  %v2931_v36 = vld [vmem:[%s2482_s16 + $0x1f0] sm:$0xff]  ;;  %v2938_v59 = vld [vmem:[%s2490_s6 + $0x48] sm:$0xff]  ;;  %v2960_v42 = vld [vmem:[%s2490_s6 + $0x58] sm:$0xff] }
  0x96   : > { %v2923_v9 = vpop.eup %1960  ;;  %v531_v56 = vadd.f32 %v530_v3, %v520_v40  ;;  %v2926_v60 = vmul.f32 %v1955_v55, %v2739_v45  ;;  %v513_v28 = vmul.f32 %v481_v1, %v2881_v14  ;;  %v515_v24 = vmul.f32 %v483_v63, %v2884_v32  ;;  %497 = vst [vmem:[%s2904_s8 + $0x8] sm:$0xff] %v481_v1 }
  0x97   : > { %499 = vst [vmem:[%s2904_s8 + $0x18] sm:$0xff] %v483_v63  ;;  %501 = vst [vmem:[%s2904_s8 + $0x28] sm:$0xff] %v485_v30  ;;  %v526_v37 = vmul.f32 %v494_v62, %v2891_v49  ;;  %v517_v40 = vmul.f32 %v485_v30, %v2894_v25  ;;  %v4131_v45 = vsub.f32 %v2667_v2, %v2772_v41  ;;  %v2950_v63 = vpop.eup %1962  ;;  %1976 = vpow2.f32 %v2860_v54 }
  0x98   : > { %503 = vst [vmem:[%s2904_s8 + $0x38] sm:$0xff] %v487_v16  ;;  %505 = vst [vmem:[%s2904_s8 + $0x48] sm:$0xff] %v489_v53  ;;  %v532_v48 = vadd.f32 %v531_v56, %v522_v0  ;;  %v519_v39 = vmul.f32 %v487_v16, %v2917_v11  ;;  %v535_v62 = vadd.f32 %v515_v24, %v513_v28  ;;  %v2967_v3 = vpop.eup %1964  ;;  %v2970_v16 = vld [vmem:[%s2490_s6 + $0x68] sm:$0xff]  ;;  %1978 = vpow2.f32 %v2871_v6 }
  0x99   : > { %v768_v61 = vmul.f32 1.442695, %v4131_v45  ;;  %507 = vst [vmem:[%s2904_s8 + $0x58] sm:$0xff] %v491_v5  ;;  %509 = vst [vmem:[%s2904_s8 + $0x68] sm:$0xff] %v493_v31  ;;  %v4132_v30 = vsub.f32 %v2697_v23, %v2772_v41  ;;  %v786_v55 = vadd.f32 %v2923_v9, %v2914_v7  ;;  %v892_v0 = vmax.f32 %v2801_v22, %v2931_v36  ;;  %v2988_v45 = vld [vmem:[%s2490_s6 + $0x78] sm:$0xff] }
  0x9a   : > { %511 = vst [vmem:[%s2904_s8 + $0x78] sm:$0xff] %v2926_v60  ;;  %v533_v1 = vadd.f32 %v532_v48, %v524_v4  ;;  %v521_v23 = vmul.f32 %v489_v53, %v2938_v59  ;;  %v536_v56 = vadd.f32 %v535_v62, %v517_v40  ;;  %v634_v38 = vadd.f32 %v2862_v58, %v633_v8  ;;  %v2979_v22 = vpop.eup %1966 }
  0x9b   : > { %v772_v2 = vmul.f32 1.442695, %v4132_v30  ;;  %v787_v27 = vadd.f32 %v2950_v63, %v786_v55  ;;  %v2977_v28 = vmax.f32 %v891_v35, %v892_v0  ;;  %v523_v4 = vmul.f32 %v491_v5, %v2960_v42 }
  0x9c   : > { %v2981_v24 = vadd.f32 %v533_v1, %v526_v37  ;;  %v537_v53 = vadd.f32 %v536_v56, %v519_v39  ;;  %v4134_v54 = vsub.f32 %v2710_v33, %v2772_v41  ;;  %v525_v48 = vmul.f32 %v493_v31, %v2970_v16  ;;  %v2994_v37 = vpop.eup %1968  ;;  %v3007_v39 = vld [vmem:[%s2482_s16 + $0x188] sm:$0xff]  ;;  %v3029_v56 = vld [vmem:[%s2482_s16 + $0x198] sm:$0xff] }
  0x9d   : > { %v635_v6 = vadd.f32 %v2875_v29, %v634_v38  ;;  %v788_v35 = vadd.f32 %v2967_v3, %v787_v27  ;;  %1980 = vpow2.f32 %v2873_v20  ;;  %v901_v5 = vsub.f32 %v2744_v10, %v2977_v28  ;;  %v3010_v20 = vld [vmem:[%s2482_s16 + $0x1a8] sm:$0xff]  ;;  %v3012_v62 = vpop.eup %1970 }
  0x9e   : > { %4133 = vst [vmem:[#allocation36_spill] sm:$0xff] %v2981_v24  ;;  %v776_v40 = vmul.f32 1.442695, %v4134_v54  ;;  %542 = vst [vmem:[%s2998_s12] sm:$0xff] %v2981_v24  ;;  %v538_v33 = vadd.f32 %v537_v53, %v521_v23  ;;  %1982 = vpow2.f32 %v768_v61  ;;  %v903_v31 = vsub.f32 %v2753_v15, %v2977_v28  ;;  %v3019_v55 = vpop.eup %1972 }
  0x9f   : > { %v636_v30 = vadd.f32 %v2888_v18, %v635_v6  ;;  %v789_v8 = vadd.f32 %v2979_v22, %v788_v35  ;;  %1984 = vpow2.f32 %v772_v2  ;;  %v4135_v61 = vsub.f32 %v2727_v52, %v2772_v41  ;;  %v3032_v52 = vld [vmem:[%s2482_s16 + $0x1b8] sm:$0xff] }
  0xa0   : > { %v527_v15 = vmul.f32 %v2926_v60, %v2988_v45  ;;  %v539_v0 = vadd.f32 %v538_v33, %v523_v4  ;;  %v753_v1 = vsub.f32 %v2730_v44, %v2772_v41  ;;  %1986 = vpow2.f32 %v776_v40  ;;  %4136 = vst [vmem:[#allocation37_spill] sm:$0xff] %v3032_v52  ;;  %v3039_v4 = vld [vmem:[%s2482_s16 + $0x1c8] sm:$0xff]  ;;  %v1975_v35 = vpop.eup %1974 }
  0xa1   : > { %v780_v10 = vmul.f32 1.442695, %v4135_v61  ;;  %1988 = vrcp.f32 %v636_v30  ;;  %v790_v23 = vadd.f32 %v2994_v37, %v789_v8  ;;  %v905_v2 = vsub.f32 %v2747_v19, %v2977_v28  ;;  %4137 = vst [vmem:[#allocation38_spill] sm:$0xff] %v3039_v4 }
  0xa2   : > { %v894_v38 = vmax.f32 %v3007_v39, %v3010_v20  ;;  %v540_v27 = vadd.f32 %v539_v0, %v525_v48  ;;  %v907_v60 = vsub.f32 %v2756_v17, %v2977_v28  ;;  %v917_v44 = vmul.f32 1.442695, %v901_v5 }
  0xa3   : > { %v921_v41 = vmul.f32 1.442695, %v903_v31  ;;  %v791_v53 = vadd.f32 %v3012_v62, %v790_v23  ;;  %1990 = vpow2.f32 %v780_v10  ;;  %v784_v54 = vmul.f32 1.442695, %v753_v1 }
  0xa4   : > { %v3042_v19 = vadd.f32 %v540_v27, %v527_v15  ;;  %1992 = vpow2.f32 %v917_v44  ;;  %v895_v40 = vmax.f32 %v3029_v56, %v3032_v52  ;;  %v909_v48 = vsub.f32 %v2780_v46, %v2977_v28  ;;  %v3058_v8 = vpop.eup %1976  ;;  %v4140_v15 = vld [vmem:[#allocation24_spill] sm:$0xff]  ;;  %v4145_v27 = vld [vmem:[#allocation29_spill] sm:$0xff] }
  0xa5   : > { %1994 = vpow2.f32 %v921_v41  ;;  %v925_v17 = vmul.f32 1.442695, %v905_v2  ;;  %v3049_v6 = vmax.f32 %v894_v38, %v3039_v4  ;;  %v792_v33 = vadd.f32 %v3019_v55, %v791_v53  ;;  %4139 = vst [vmem:[#allocation40_spill] sm:$0xff] %v3058_v8  ;;  %v3067_v1 = vpop.eup %1978  ;;  %v4144_v2 = vld [vmem:[#allocation26_spill] sm:$0xff]  ;;  %v4147_v41 = vld [vmem:[#allocation31_spill] sm:$0xff] }
  0xa6   : > { %4138 = vst [vmem:[#allocation39_spill] sm:$0xff] %v3042_v19  ;;  %543 = vst [vmem:[%s2998_s12 + $0x8] sm:$0xff] %v3042_v19  ;;  %v911_v5 = vsub.f32 %v2787_v57, %v2977_v28  ;;  %v913_v31 = vsub.f32 %v2900_v12, %v2977_v28  ;;  %v929_v30 = vmul.f32 1.442695, %v907_v60  ;;  %v641_v46 = vmul.f32 %v1975_v35, %v2749_v47  ;;  %v3065_v57 = vld [vmem:[%s2482_s16 + $0x1d8] sm:$0xff]  ;;  %v4143_v12 = vld [vmem:[#allocation25_spill] sm:$0xff] }
  0xa7   : > { %v643_v61 = vmul.f32 %v1975_v35, %v2758_v13  ;;  %v645_v10 = vmul.f32 %v1975_v35, %v2762_v26  ;;  %v647_v0 = vmul.f32 %v1975_v35, %v4140_v15  ;;  %4141 = vst [vmem:[#allocation24_spill] sm:$0xff] %v3065_v57  ;;  %4142 = vst [vmem:[#allocation41_spill] sm:$0xff] %v3067_v1  ;;  %v4146_v60 = vld [vmem:[#allocation30_spill] sm:$0xff]  ;;  %1996 = vpow2.f32 %v925_v17  ;;  %v3077_v15 = vld [vmem:[%s2482_s16 + $0x1e8] sm:$0xff] }
  0xa8   : > { %v649_v23 = vmul.f32 %v1975_v35, %v4143_v12  ;;  %v651_v38 = vmul.f32 %v1975_v35, %v4144_v2  ;;  %v653_v47 = vmul.f32 %v1975_v35, %v2807_v21  ;;  %v655_v13 = vmul.f32 %v1975_v35, %v2827_v43  ;;  %4148 = vst [vmem:[#allocation25_spill] sm:$0xff] %v3077_v15  ;;  %v4149_v17 = vld [vmem:[#allocation33_spill] sm:$0xff] }
  0xa9   : > { %v674_v26 = vmul.f32 %v641_v46, %v4145_v27  ;;  %v676_v44 = vmul.f32 %v643_v61, %v4146_v60  ;;  %v678_v53 = vmul.f32 %v645_v10, %v4147_v41  ;;  %1672 = vst [vmem:[%s2904_s8 + $0x80] sm:$0xff] %v641_v46  ;;  %1674 = vst [vmem:[%s2904_s8 + $0x90] sm:$0xff] %v643_v61  ;;  %1998 = vpow2.f32 %v784_v54  ;;  %v3096_v61 = vld [vmem:[%s2482_s16 + $0x1f8] sm:$0xff] }
  0xaa   : > { %1676 = vst [vmem:[%s2904_s8 + $0xa0] sm:$0xff] %v645_v10  ;;  %1678 = vst [vmem:[%s2904_s8 + $0xb0] sm:$0xff] %v647_v0  ;;  %v3083_v21 = vpop.eup %1980  ;;  %v933_v43 = vmul.f32 1.442695, %v909_v48  ;;  %v897_v35 = vmax.f32 %v895_v40, %v3065_v57  ;;  %v680_v2 = vmul.f32 %v647_v0, %v4149_v17  ;;  %2000 = vrcp.f32 %v792_v33  ;;  %v4150_v33 = vld [vmem:[#allocation34_spill] sm:$0xff] }
  0xab   : > { %1680 = vst [vmem:[%s2904_s8 + $0xc0] sm:$0xff] %v649_v23  ;;  %1682 = vst [vmem:[%s2904_s8 + $0xd0] sm:$0xff] %v651_v38  ;;  %v3090_v12 = vpop.eup %1982  ;;  %v690_v19 = vadd.f32 %v676_v44, %v674_v26  ;;  %v793_v46 = vadd.f32 %v3067_v1, %v3058_v8  ;;  %v915_v54 = vsub.f32 %v2931_v36, %v2977_v28  ;;  %v937_v40 = vmul.f32 1.442695, %v911_v5  ;;  %v4151_v8 = vld [vmem:[#allocation35_spill] sm:$0xff] }
  0xac   : > { %1684 = vst [vmem:[%s2904_s8 + $0xe0] sm:$0xff] %v653_v47  ;;  %1686 = vst [vmem:[%s2904_s8 + $0xf0] sm:$0xff] %v655_v13  ;;  %v3098_v10 = vpop.eup %1984  ;;  %v941_v48 = vmul.f32 1.442695, %v913_v31  ;;  %v898_v24 = vmax.f32 %v3049_v6, %v3077_v15  ;;  %v682_v0 = vmul.f32 %v649_v23, %v2852_v51  ;;  %v684_v26 = vmul.f32 %v651_v38, %v4150_v33  ;;  %v4152_v6 = vld [vmem:[#allocation27_spill] sm:$0xff]  ;;  %v4153_v31 = vld [vmem:[#allocation28_spill] sm:$0xff] }
  0xad   : > { %v3104_v57 = vpop.eup %1986  ;;  %v691_v44 = vadd.f32 %v690_v19, %v678_v53  ;;  %2002 = vpow2.f32 %v929_v30  ;;  %v686_v4 = vmul.f32 %v653_v47, %v4151_v8  ;;  %v794_v52 = vadd.f32 %v3083_v21, %v793_v46  ;;  %v4154_v15 = vld [vmem:[#allocation32_spill] sm:$0xff] }
  0xae   : > { %v1989_v1 = vpop.eup %1988  ;;  %2004 = vpow2.f32 %v933_v43  ;;  %v899_v36 = vmax.f32 %v897_v35, %v3096_v61 }
  0xaf   : > { %v692_v28 = vadd.f32 %v691_v44, %v680_v2  ;;  %v642_v5 = vmul.f32 %v1989_v1, %v4152_v6  ;;  %v644_v23 = vmul.f32 %v1989_v1, %v4153_v31  ;;  %v646_v38 = vmul.f32 %v1989_v1, %v4154_v15 }
  0xb0   : > { %v3114_v19 = vpop.eup %1990  ;;  %v648_v30 = vmul.f32 %v1989_v1, %v2843_v34  ;;  %v650_v47 = vmul.f32 %v1989_v1, %v2849_v50  ;;  %v652_v53 = vmul.f32 %v1989_v1, %v2862_v58  ;;  %v654_v43 = vmul.f32 %v1989_v1, %v2875_v29 }
  0xb1   : > { %v3120_v35 = vpop.eup %1992  ;;  %v693_v2 = vadd.f32 %v692_v28, %v682_v0  ;;  %v656_v46 = vmul.f32 %v1989_v1, %v2888_v18  ;;  %v675_v15 = vmul.f32 %v642_v5, %v2881_v14  ;;  %v677_v44 = vmul.f32 %v644_v23, %v2884_v32  ;;  %1673 = vst [vmem:[%s2904_s8 + $0x88] sm:$0xff] %v642_v5 }
  0xb2   : > { %1675 = vst [vmem:[%s2904_s8 + $0x98] sm:$0xff] %v644_v23  ;;  %1677 = vst [vmem:[%s2904_s8 + $0xa8] sm:$0xff] %v646_v38  ;;  %v3128_v50 = vpop.eup %1994  ;;  %v688_v34 = vmul.f32 %v655_v13, %v2891_v49  ;;  %v679_v29 = vmul.f32 %v646_v38, %v2894_v25  ;;  %v945_v58 = vmul.f32 1.442695, %v915_v54  ;;  %v681_v1 = vmul.f32 %v648_v30, %v2917_v11 }
  0xb3   : > { %1679 = vst [vmem:[%s2904_s8 + $0xb8] sm:$0xff] %v648_v30  ;;  %1681 = vst [vmem:[%s2904_s8 + $0xc8] sm:$0xff] %v650_v47  ;;  %v694_v18 = vadd.f32 %v693_v2, %v684_v26  ;;  %v697_v0 = vadd.f32 %v677_v44, %v675_v15  ;;  %2006 = vpow2.f32 %v937_v40  ;;  %v683_v28 = vmul.f32 %v650_v47, %v2938_v59 }
  0xb4   : > { %1683 = vst [vmem:[%s2904_s8 + $0xd8] sm:$0xff] %v652_v53  ;;  %1685 = vst [vmem:[%s2904_s8 + $0xe8] sm:$0xff] %v654_v43  ;;  %v795_v6 = vadd.f32 %v3090_v12, %v794_v52  ;;  %v3140_v5 = vmax.f32 %v898_v24, %v899_v36  ;;  %2008 = vpow2.f32 %v941_v48  ;;  %v949_v54 = vadd.f32 %v3128_v50, %v3120_v35  ;;  %v3144_v23 = vpop.eup %1996 }
  0xb5   : > { %1687 = vst [vmem:[%s2904_s8 + $0xf8] sm:$0xff] %v656_v46  ;;  %v695_v13 = vadd.f32 %v694_v18, %v686_v4  ;;  %v698_v31 = vadd.f32 %v697_v0, %v679_v29  ;;  %v685_v30 = vmul.f32 %v652_v53, %v2960_v42  ;;  %2010 = vpow2.f32 %v945_v58 }
  0xb6   : > { %v796_v26 = vadd.f32 %v3098_v10, %v795_v6  ;;  %v3147_v38 = vpop.eup %1998  ;;  %v687_v4 = vmul.f32 %v654_v43, %v2970_v16  ;;  %v689_v48 = vmul.f32 %v656_v46, %v2988_v45  ;;  %v902_v36 = vsub.f32 %v3007_v39, %v3140_v5 }
  0xb7   : > { %v3149_v40 = vadd.f32 %v695_v13, %v688_v34  ;;  %v699_v52 = vadd.f32 %v698_v31, %v681_v1  ;;  %v2001_v24 = vpop.eup %2000  ;;  %v950_v15 = vadd.f32 %v3144_v23, %v949_v54  ;;  %v904_v53 = vsub.f32 %v3029_v56, %v3140_v5 }
  0xb8   : > { %v797_v2 = vadd.f32 %v3104_v57, %v796_v26  ;;  %v804_v43 = vmul.f32 %v2001_v24, %v2914_v7  ;;  %v806_v39 = vmul.f32 %v2001_v24, %v2923_v9  ;;  %v808_v46 = vmul.f32 %v2001_v24, %v2950_v63 }
  0xb9   : > { %1688 = vst [vmem:[%s2998_s12 + $0x10] sm:$0xff] %v3149_v40  ;;  %v700_v47 = vadd.f32 %v699_v52, %v683_v28  ;;  %v810_v34 = vmul.f32 %v2001_v24, %v2967_v3  ;;  %v812_v56 = vmul.f32 %v2001_v24, %v2979_v22  ;;  %v814_v18 = vmul.f32 %v2001_v24, %v2994_v37 }
  0xba   : > { %v3162_v44 = vpop.eup %2002  ;;  %v816_v1 = vmul.f32 %v2001_v24, %v3012_v62  ;;  %v818_v7 = vmul.f32 %v2001_v24, %v3019_v55  ;;  %v837_v9 = vmul.f32 %v804_v43, %v4145_v27  ;;  %v839_v63 = vmul.f32 %v806_v39, %v4146_v60  ;;  %1706 = vst [vmem:[%s2904_s8 + $0x100] sm:$0xff] %v804_v43 }
  0xbb   : > { %v3168_v29 = vpop.eup %2004  ;;  %v701_v58 = vadd.f32 %v700_v47, %v685_v30  ;;  %v841_v3 = vmul.f32 %v808_v46, %v4147_v41  ;;  %1708 = vst [vmem:[%s2904_s8 + $0x110] sm:$0xff] %v806_v39  ;;  %1710 = vst [vmem:[%s2904_s8 + $0x120] sm:$0xff] %v808_v46  ;;  %v843_v22 = vmul.f32 %v810_v34, %v4149_v17  ;;  %v919_v13 = vmul.f32 1.442695, %v902_v36 }
  0xbc   : > { %1712 = vst [vmem:[%s2904_s8 + $0x130] sm:$0xff] %v810_v34  ;;  %1714 = vst [vmem:[%s2904_s8 + $0x140] sm:$0xff] %v812_v56  ;;  %v853_v37 = vadd.f32 %v839_v63, %v837_v9  ;;  %v798_v62 = vadd.f32 %v3114_v19, %v797_v2  ;;  %v906_v55 = vsub.f32 %v3010_v20, %v3140_v5  ;;  %v923_v52 = vmul.f32 1.442695, %v904_v53  ;;  %v4156_v2 = vld [vmem:[#allocation37_spill] sm:$0xff]  ;;  %v4157_v34 = vld [vmem:[#allocation38_spill] sm:$0xff] }
  0xbd   : > { %v702_v0 = vadd.f32 %v701_v58, %v687_v4  ;;  %1716 = vst [vmem:[%s2904_s8 + $0x150] sm:$0xff] %v814_v18  ;;  %1718 = vst [vmem:[%s2904_s8 + $0x160] sm:$0xff] %v816_v1  ;;  %v951_v6 = vadd.f32 %v3162_v44, %v950_v15  ;;  %v845_v54 = vmul.f32 %v812_v56, %v2852_v51  ;;  %v4158_v9 = vld [vmem:[#allocation24_spill] sm:$0xff] }
  0xbe   : > { %1720 = vst [vmem:[%s2904_s8 + $0x170] sm:$0xff] %v818_v7  ;;  %v854_v26 = vadd.f32 %v853_v37, %v841_v3  ;;  %v799_v30 = vadd.f32 %v3147_v38, %v798_v62  ;;  %v847_v20 = vmul.f32 %v814_v18, %v4150_v33  ;;  %v927_v47 = vmul.f32 1.442695, %v906_v55 }
  0xbf   : > { %v3189_v28 = vadd.f32 %v702_v0, %v689_v48  ;;  %v952_v24 = vadd.f32 %v3168_v29, %v951_v6  ;;  %v908_v15 = vsub.f32 %v4156_v2, %v3140_v5  ;;  %v849_v53 = vmul.f32 %v816_v1, %v4151_v8  ;;  %v4159_v0 = vld [vmem:[#allocation25_spill] sm:$0xff] }
  0xc0   : > { %v3192_v31 = vpop.eup %2006  ;;  %v855_v48 = vadd.f32 %v854_v26, %v843_v22  ;;  %2012 = vrcp.f32 %v799_v30  ;;  %v910_v58 = vsub.f32 %v4157_v34, %v3140_v5  ;;  %v851_v56 = vmul.f32 %v818_v7, %v2891_v49 }
  0xc1   : > { %4155 = vst [vmem:[#allocation26_spill] sm:$0xff] %v3189_v28  ;;  %1689 = vst [vmem:[%s2998_s12 + $0x18] sm:$0xff] %v3189_v28  ;;  %v3199_v4 = vpop.eup %2008  ;;  %v953_v36 = vadd.f32 %v3192_v31, %v952_v24  ;;  %2014 = vpow2.f32 %v919_v13  ;;  %v912_v63 = vsub.f32 %v4158_v9, %v3140_v5  ;;  %v914_v1 = vsub.f32 %v4159_v0, %v3140_v5 }
  0xc2   : > { %v3205_v43 = vpop.eup %2010  ;;  %v856_v39 = vadd.f32 %v855_v48, %v845_v54  ;;  %2016 = vpow2.f32 %v923_v52  ;;  %v931_v22 = vmul.f32 1.442695, %v908_v15  ;;  %v935_v62 = vmul.f32 1.442695, %v910_v58 }
  0xc3   : > { %v954_v46 = vadd.f32 %v3199_v4, %v953_v36  ;;  %2018 = vpow2.f32 %v927_v47  ;;  %v939_v6 = vmul.f32 1.442695, %v912_v63  ;;  %v916_v7 = vsub.f32 %v3096_v61, %v3140_v5  ;;  %v4161_v61 = vld [vmem:[#allocation41_spill] sm:$0xff] }
  0xc4   : > { %v857_v18 = vadd.f32 %v856_v39, %v847_v20  ;;  %v943_v13 = vmul.f32 1.442695, %v914_v1  ;;  %v1105_v54 = vlaneseq  ;;  %v4160_v20 = vld [vmem:[#allocation40_spill] sm:$0xff] }
  0xc5   : > { %v955_v3 = vadd.f32 %v3205_v43, %v954_v46  ;;  %v947_v30 = vmul.f32 1.442695, %v916_v7 }
  0xc6   : > { %v858_v37 = vadd.f32 %v857_v18, %v849_v53  ;;  %v1106_v52 = vshrl.u32 %v1105_v54, 7  ;;  %v3259_v9 = vand.u32 127, %v1105_v54 }
  0xc7   : > { %2020 = vrcp.f32 %v955_v3 }
  0xc8   : > { %v3217_v55 = vadd.f32 %v858_v37, %v851_v56  ;;  %2022 = vpow2.f32 %v931_v22  ;;  %v3261_v63 = vand.u32 3, %v1106_v52 }
  0xc9   : > { %2024 = vpow2.f32 %v935_v62 }
  0xca   : > { %1722 = vst [vmem:[%s2998_s12 + $0x20] sm:$0xff] %v3217_v55  ;;  %2026 = vpow2.f32 %v939_v6  ;;  %vm1146_vm0 = vcmp.eq.s32.totalorder %v3261_v63, 0  ;;  %vm1155_vm5 = vcmp.eq.s32.totalorder %v3261_v63, 1  ;;  %vm1160_vm6 = vcmp.eq.s32.totalorder %v3261_v63, 2 }
  0xcb   : > { %2028 = vpow2.f32 %v943_v13  ;;  %vm1165_vm8 = vcmp.eq.s32.totalorder %v3261_v63, 3 }
  0xcc   : > { %2030 = vpow2.f32 %v947_v30 }
  0xcd   : > { %v2013_v26 = vpop.eup %2012 }
  0xce   : > { %v3223_v24 = vpop.eup %2014  ;;  %v805_v48 = vmul.f32 %v2013_v26, %v4160_v20  ;;  %v807_v5 = vmul.f32 %v2013_v26, %v4161_v61  ;;  %v809_v47 = vmul.f32 %v2013_v26, %v3083_v21  ;;  %v811_v36 = vmul.f32 %v2013_v26, %v3090_v12 }
  0xcf   : > { %v3229_v2 = vpop.eup %2016  ;;  %v813_v15 = vmul.f32 %v2013_v26, %v3098_v10  ;;  %v815_v53 = vmul.f32 %v2013_v26, %v3104_v57  ;;  %v817_v39 = vmul.f32 %v2013_v26, %v3114_v19  ;;  %v819_v46 = vmul.f32 %v2013_v26, %v3147_v38  ;;  %v4162_v38 = vld [vmem:[#allocation36_spill] sm:$0xff] }
  0xd0   : > { %v838_v34 = vmul.f32 %v805_v48, %v2881_v14  ;;  %v840_v21 = vmul.f32 %v807_v5, %v2884_v32  ;;  %v842_v58 = vmul.f32 %v809_v47, %v2894_v25  ;;  %1707 = vst [vmem:[%s2904_s8 + $0x108] sm:$0xff] %v805_v48  ;;  %1709 = vst [vmem:[%s2904_s8 + $0x118] sm:$0xff] %v807_v5  ;;  %v3242_v12 = vpop.eup %2018  ;;  %v1126_v5 = vand.u32 1, %v3259_v9 }
  0xd1   : > { %1711 = vst [vmem:[%s2904_s8 + $0x128] sm:$0xff] %v809_v47  ;;  %1713 = vst [vmem:[%s2904_s8 + $0x138] sm:$0xff] %v811_v36  ;;  %v844_v57 = vmul.f32 %v811_v36, %v2917_v11  ;;  %v956_v19 = vadd.f32 %v3229_v2, %v3223_v24  ;;  %v3253_v56 = vmin.f32 %v4162_v38, %v3149_v40 }
  0xd2   : > { %1715 = vst [vmem:[%s2904_s8 + $0x148] sm:$0xff] %v813_v15  ;;  %1717 = vst [vmem:[%s2904_s8 + $0x158] sm:$0xff] %v815_v53  ;;  %v860_v10 = vadd.f32 %v840_v21, %v838_v34  ;;  %v3257_v18 = vmax.f32 %v4162_v38, %v3149_v40  ;;  %v846_v0 = vmul.f32 %v813_v15, %v2938_v59  ;;  %vm3315_vm1 = vcmp.eq.s32.totalorder %v1126_v5, 0 }
  0xd3   : > { %1719 = vst [vmem:[%s2904_s8 + $0x168] sm:$0xff] %v817_v39  ;;  %1721 = vst [vmem:[%s2904_s8 + $0x178] sm:$0xff] %v819_v46  ;;  %v848_v1 = vmul.f32 %v815_v53, %v2960_v42  ;;  %v957_v37 = vadd.f32 %v3242_v12, %v956_v19  ;;  %v852_v36 = vmul.f32 %v819_v46, %v2988_v45  ;;  %v1057_v21 = vmul.f32 3.0, %v3253_v56 }
  0xd4   : > { %v2021_v3 = vpop.eup %2020  ;;  %v861_v22 = vadd.f32 %v860_v10, %v842_v58  ;;  %vm3343_vm2 = vmand %vm1146_vm0, %vm3315_vm1  ;;  %vm3347_vm3 = vcmp.eq.s32.totalorder %v1126_v5, 1 }
  0xd5   : > { %v967_v62 = vmul.f32 %v2021_v3, %v3120_v35  ;;  %v969_v6 = vmul.f32 %v2021_v3, %v3128_v50  ;;  %v971_v7 = vmul.f32 %v2021_v3, %v3144_v23  ;;  %v973_v13 = vmul.f32 %v2021_v3, %v3162_v44  ;;  %v3270_v54 = vpop.eup %2022  ;;  %vm3372_vm4 = vmand %vm1146_vm0, %vm3347_vm3 }
  0xd6   : > { %v862_v26 = vadd.f32 %v861_v22, %v844_v57  ;;  %v975_v30 = vmul.f32 %v2021_v3, %v3168_v29  ;;  %v977_v52 = vmul.f32 %v2021_v3, %v3192_v31  ;;  %v979_v20 = vmul.f32 %v2021_v3, %v3199_v4  ;;  %v3283_v48 = vpop.eup %2024  ;;  %vm3416_vm7 = vmand %vm1155_vm5, %vm3315_vm1 }
  0xd7   : > { %v981_v35 = vmul.f32 %v2021_v3, %v3205_v43  ;;  %v1000_v50 = vmul.f32 %v967_v62, %v4145_v27  ;;  %v1002_v23 = vmul.f32 %v969_v6, %v4146_v60  ;;  %v1004_v44 = vmul.f32 %v971_v7, %v4147_v41  ;;  %1740 = vst [vmem:[%s2904_s8 + $0x180] sm:$0xff] %v967_v62  ;;  %v3293_v60 = vpop.eup %2026  ;;  %vm3463_vm9 = vmand %vm1155_vm5, %vm3347_vm3 }
  0xd8   : > { %1742 = vst [vmem:[%s2904_s8 + $0x190] sm:$0xff] %v969_v6  ;;  %1744 = vst [vmem:[%s2904_s8 + $0x1a0] sm:$0xff] %v971_v7  ;;  %v850_v29 = vmul.f32 %v817_v39, %v2970_v16  ;;  %v863_v31 = vadd.f32 %v862_v26, %v846_v0  ;;  %v3290_v4 = vmul.f32 2.0, %v3253_v56  ;;  %v1045_v27 = vmul.f32 2.0, %v3257_v18  ;;  %v3299_v47 = vpop.eup %2028 }
  0xd9   : > { %1746 = vst [vmem:[%s2904_s8 + $0x1b0] sm:$0xff] %v973_v13  ;;  %1748 = vst [vmem:[%s2904_s8 + $0x1c0] sm:$0xff] %v975_v30  ;;  %v1006_v41 = vmul.f32 %v973_v13, %v4149_v17  ;;  %v1016_v43 = vadd.f32 %v1002_v23, %v1000_v50  ;;  %v958_v61 = vadd.f32 %v3270_v54, %v957_v37  ;;  %v3319_v3 = vpop.eup %2030 }
  0xda   : > { %1750 = vst [vmem:[%s2904_s8 + $0x1d0] sm:$0xff] %v977_v52  ;;  %1752 = vst [vmem:[%s2904_s8 + $0x1e0] sm:$0xff] %v979_v20  ;;  %v864_v15 = vadd.f32 %v863_v31, %v848_v1  ;;  %v1008_v53 = vmul.f32 %v975_v30, %v2852_v51  ;;  %v3307_v17 = vsub.f32 %v3290_v4, %v3257_v18  ;;  %v4165_v1 = vld [vmem:[#allocation39_spill] sm:$0xff]  ;;  %v3365_v31 = vadd.s32 128, %v3259_v9 }
  0xdb   : > { %1754 = vst [vmem:[%s2904_s8 + $0x1f0] sm:$0xff] %v981_v35  ;;  %v1017_v39 = vadd.f32 %v1016_v43, %v1004_v44  ;;  %v959_v34 = vadd.f32 %v3283_v48, %v958_v61  ;;  %v3310_v57 = vsub.f32 %v1045_v27, %v3253_v56  ;;  %v1010_v46 = vmul.f32 %v977_v52, %v4150_v33  ;;  %vm3481_vm10 = vmand %vm1160_vm6, %vm3315_vm1 }
  0xdc   : > { %v865_v58 = vadd.f32 %v864_v15, %v850_v29  ;;  %v1245_v0 = vadd.f32 %v3149_v40, %v4162_v38  ;;  %v3325_v22 = vmin.f32 %v4165_v1, %v3189_v28  ;;  %v1012_v33 = vmul.f32 %v979_v20, %v4151_v8  ;;  %vm3491_vm11 = vmand %vm1160_vm6, %vm3347_vm3 }
  0xdd   : > { %v1018_v10 = vadd.f32 %v1017_v39, %v1006_v41  ;;  %v960_v51 = vadd.f32 %v3293_v60, %v959_v34  ;;  %v1059_v7 = vsub.f32 %v1057_v21, %v1045_v27  ;;  %v3334_v13 = vmul.f32 3.0, %v3307_v17  ;;  %vm3562_vm13 = vmand %vm1165_vm8, %vm3315_vm1 }
  0xde   : > { %v3327_v37 = vadd.f32 %v865_v58, %v852_v36  ;;  %v3337_v26 = vmul.f32 2.0, %v3310_v57  ;;  %v3353_v52 = vmax.f32 %v4165_v1, %v3189_v28  ;;  %v1014_v20 = vmul.f32 %v981_v35, %v2891_v49  ;;  %vm3581_vm14 = vmand %vm1165_vm8, %vm3347_vm3 }
  0xdf   : > { %v1019_v62 = vadd.f32 %v1018_v10, %v1008_v53  ;;  %v961_v6 = vadd.f32 %v3299_v47, %v960_v51  ;;  %v3359_v44 = vadd.f32 %v3189_v28, %v4165_v1  ;;  %v3362_v29 = vmul.f32 2.0, %v3325_v22 }
  0xe0   : > { %1723 = vst [vmem:[%s2998_s12 + $0x28] sm:$0xff] %v3327_v37  ;;  %v1247_v27 = vadd.f32 %v1245_v0, %v3217_v55  ;;  %v1170_v35 = vsel %vm3343_vm2, %v1059_v7, 0.0  ;;  %v1069_v9 = vsub.f32 %v3334_v13, %v3337_v26  ;;  %v3383_v43 = vmul.f32 2.0, %v3307_v17 }
  0xe1   : > { %v1020_v50 = vadd.f32 %v1019_v62, %v1010_v46  ;;  %v962_v23 = vadd.f32 %v3319_v3, %v961_v6  ;;  %4170 = vst [vmem:[#allocation29_spill] sm:$0xff] %v3362_v29  ;;  %v3386_v5 = vmul.f32 2.0, %v3353_v52  ;;  %v3389_v36 = vmul.f32 3.0, %v3325_v22 }
  0xe2   : > { %v1188_v15 = vsel %vm3343_vm2, %v3307_v17, 0.0  ;;  %v1172_v53 = vsel %vm3372_vm4, %v3253_v56, %v1170_v35  ;;  %v3399_v39 = vsub.f32 %v3362_v29, %v3353_v52  ;;  %v3403_v21 = vmul.f32 3.0, %v3257_v18 }
  0xe3   : > { %v1021_v41 = vadd.f32 %v1020_v50, %v1012_v33  ;;  %2032 = vrcp.f32 %v962_v23  ;;  %v1207_v0 = vsel %vm3343_vm2, %v3253_v56, 0.0  ;;  %v1073_v33 = vsub.f32 %v3383_v43, %v3310_v57 }
  0xe4   : > { %v1190_v62 = vsel %vm3372_vm4, %v3257_v18, %v1188_v15  ;;  %v3433_v7 = vmul.f32 3.0, %v3310_v57  ;;  %v1226_v35 = vsel %vm3343_vm2, %v3257_v18, 0.0 }
  0xe5   : > { %v1022_v61 = vadd.f32 %v1021_v41, %v1014_v20  ;;  %v1063_v41 = vsub.f32 %v3403_v21, %v3290_v4 }
  0xe7   : > { %1756 = vst [vmem:[%s2998_s12 + $0x30] sm:$0xff] %v1022_v61  ;;  %v3407_v58 = vmin.f32 %v3217_v55, %v1022_v61  ;;  %v3410_v46 = vmax.f32 %v3217_v55, %v1022_v61  ;;  %v1249_v10 = vadd.f32 %v1247_v27, %v1022_v61  ;;  %v3449_v27 = vsel %vm3372_vm4, %v3310_v57, %v1207_v0 }
  0xe9   : > { %v1251_v56 = vmul.f32 0.25, %v1249_v10  ;;  %v3439_v13 = vmul.f32 2.0, %v3407_v58  ;;  %v1053_v20 = vmul.f32 2.0, %v3410_v46  ;;  %v1081_v50 = vmul.f32 3.0, %v3407_v58 }
  0xea   : > { %v1174_v23 = vsel %vm3416_vm7, %v3407_v58, %v1172_v53 }
  0xeb   : > { %v1253_v15 = vsub.f32 %v4162_v38, %v1251_v56  ;;  %v1257_v10 = vsub.f32 %v3149_v40, %v1251_v56  ;;  %v1263_v6 = vsub.f32 %v3217_v55, %v1251_v56  ;;  %v1269_v34 = vsub.f32 %v1022_v61, %v1251_v56 }
  0xec   : > { %v3472_v18 = vsub.f32 %v3439_v13, %v3410_v46  ;;  %v3475_v40 = vsub.f32 %v1053_v20, %v3407_v58  ;;  %v1083_v55 = vsub.f32 %v1081_v50, %v1053_v20  ;;  %v1192_v56 = vsel %vm3416_vm7, %v3410_v46, %v1190_v62 }
  0xed   : > { %v1255_v30 = vmul.f32 %v1253_v15, %v1253_v15  ;;  %v1259_v61 = vmul.f32 %v1257_v10, %v1257_v10  ;;  %v1265_v21 = vmul.f32 %v1263_v6, %v1263_v6  ;;  %v3507_v15 = vmul.f32 3.0, %v3410_v46 }
  0xee   : > { %v3499_v20 = vmul.f32 3.0, %v3472_v18  ;;  %v3502_v50 = vmul.f32 2.0, %v3475_v40  ;;  %v1176_v6 = vsel %vm3463_vm9, %v1083_v55, %v1174_v23  ;;  %v1271_v4 = vmul.f32 %v1269_v34, %v1269_v34 }
  0xef   : > { %v1261_v10 = vadd.f32 %v1259_v61, %v1255_v30  ;;  %v1178_v28 = vsel %vm3481_vm10, %v1069_v9, %v1176_v6  ;;  %v3513_v62 = vmul.f32 2.0, %v3472_v18  ;;  %v1194_v55 = vsel %vm3463_vm9, %v3472_v18, %v1192_v56 }
  0xf0   : > { %v2033_v1 = vpop.eup %2032  ;;  %v1093_v29 = vsub.f32 %v3499_v20, %v3502_v50  ;;  %v1180_v23 = vsel %vm3491_vm11, %v3307_v17, %v1178_v28  ;;  %v1211_v9 = vsel %vm3416_vm7, %v3475_v40, %v3449_v27  ;;  %v4181_v6 = vand.u32 1, %v3365_v31 }
  0xf1   : > { %v1267_v34 = vadd.f32 %v1265_v21, %v1261_v10  ;;  %v968_v30 = vmul.f32 %v2033_v1, %v3223_v24  ;;  %v970_v61 = vmul.f32 %v2033_v1, %v3229_v2  ;;  %v972_v28 = vmul.f32 %v2033_v1, %v3242_v12 }
  0xf2   : > { %vm3533_vm12 = vcmp.eq.s32.totalorder %v4181_v6, 0  ;;  %v974_v27 = vmul.f32 %v2033_v1, %v3270_v54  ;;  %v976_v24 = vmul.f32 %v2033_v1, %v3283_v48  ;;  %v3545_v2 = vmul.f32 %v2033_v1, %v3293_v60 }
  0xf3   : > { %v3548_v12 = vmul.f32 %v2033_v1, %v3299_v47  ;;  %v3551_v21 = vmul.f32 %v2033_v1, %v3319_v3  ;;  %v1001_v10 = vmul.f32 %v968_v30, %v2881_v14  ;;  %v1003_v6 = vmul.f32 %v970_v61, %v2884_v32  ;;  %1741 = vst [vmem:[%s2904_s8 + $0x188] sm:$0xff] %v968_v30 }
  0xf4   : > { %1743 = vst [vmem:[%s2904_s8 + $0x198] sm:$0xff] %v970_v61  ;;  %1745 = vst [vmem:[%s2904_s8 + $0x1a8] sm:$0xff] %v972_v28  ;;  %v1196_v48 = vsel %vm3481_vm10, %v1073_v33, %v1194_v55  ;;  %v1005_v14 = vmul.f32 %v972_v28, %v2894_v25  ;;  %v1097_v25 = vsub.f32 %v3513_v62, %v3475_v40 }
  0xf5   : > { %1747 = vst [vmem:[%s2904_s8 + $0x1b8] sm:$0xff] %v974_v27  ;;  %1749 = vst [vmem:[%s2904_s8 + $0x1c8] sm:$0xff] %v976_v24  ;;  %v1087_v60 = vsub.f32 %v3507_v15, %v3439_v13  ;;  %v1228_v47 = vsel %vm3372_vm4, %v1063_v41, %v1226_v35  ;;  %v3591_v19 = vadd.f32 %v1271_v4, %v1267_v34 }
  0xf6   : > { %1751 = vst [vmem:[%s2904_s8 + $0x1d8] sm:$0xff] %v3545_v2  ;;  %1753 = vst [vmem:[%s2904_s8 + $0x1e8] sm:$0xff] %v3548_v12  ;;  %v1007_v3 = vmul.f32 %v974_v27, %v2917_v11  ;;  %v1009_v1 = vmul.f32 %v976_v24, %v2938_v59  ;;  %v1023_v8 = vadd.f32 %v1003_v6, %v1001_v10 }
  0xf7   : > { %1755 = vst [vmem:[%s2904_s8 + $0x1f8] sm:$0xff] %v3551_v21  ;;  %v1182_v33 = vsel %vm3562_vm13, %v3472_v18, %v1180_v23  ;;  %v1198_v13 = vsel %vm3491_vm11, %v3310_v57, %v1196_v48  ;;  %v1099_v49 = vsub.f32 %v3502_v50, %v3472_v18  ;;  %v1213_v11 = vsel %vm3463_vm9, %v3407_v58, %v1211_v9 }
  0xf8   : > { %2119 = shalt.err (!%p2116_p5)
}
  0xf9   : > { %s2120_s13 = scalar_lea.hbm %s3540_s15, 8192  ;;  %s2124_s4 = scalar_lea.hbm %s4056_s2, 49152 }
  0xfa   : > { %p2121_p1 = scmp.ne.s32.totalorder %s3540_s15, %s2120_s13  ;;  %p2125_p10 = scmp.lt.s32.totalorder %s3540_s15, %s4056_s2 }
  0xfb   : > { %p2126_p11 = scmp.lt.s32.totalorder %s2124_s4, %s2120_s13 }
  0xfc   : > { %p2122_p6 = pnand %p2121_p1, %p2405_p9 }
  0xfd   : > { %p2127_p8 = por %p2126_p11, %p2125_p10 }
  0xfe   : > { %p2123_p7 = pneg %p2122_p6 }
 0x100   : > { %p2128_p0 = pnand %p2127_p8, %p2123_p7 }
 0x102   : > { %2131 = shalt.err (!%p2128_p0)
}
 0x103   : > { %s2300_s17 = smov 256   ;;  %s2301_s21 = smov 768   ;;  %v1024_v59 = vadd.f32 %v1023_v8, %v1005_v14  ;;  %v1184_v58 = vsel %vm3581_vm14, %v1093_v29, %v1182_v33  ;;  %v1200_v41 = vsel %vm3562_vm13, %v3475_v40, %v1198_v13  ;;  %v1215_v35 = vsel %vm3481_vm10, %v3307_v17, %v1213_v11  ;;  %vm3700_vm15 = vmand %vm1146_vm0, %vm3533_vm12 }
 0x104   : > { %s2302_s10 = smov 16   ;;  %s1783_s29 = smul.u32 24, %s2280_s22  ;;  %v1202_v4 = vsel %vm3581_vm14, %v1097_v25, %v1200_v41  ;;  %v4188_v29 = vsub.f32 %v3337_v26, %v3307_v17  ;;  %v1101_v50 = vmul.f32 3.0, %v3475_v40  ;;  %v1230_v15 = vsel %vm3416_vm7, %v1087_v60, %v1228_v47 }
 0x105   : > { %1790 = dma.vmem_to_hbm [thread:$0]  (%p2405_p9), %s3568_s11, 8192, %s3540_s15, %s1316_s28, %s2300_s17, %s2301_s21, %s2302_s10   ;;  %v1011_v23 = vmul.f32 %v3545_v2, %v2960_v42  ;;  %v1025_v55 = vadd.f32 %v1024_v59, %v1007_v3  ;;  %v1232_v17 = vsel %vm3463_vm9, %v3410_v46, %v1230_v15  ;;  %v3671_v26 = vsub.f32 %v3386_v5, %v3325_v22 }
 0x106   : > { %s3648_s7 = scalar_lea.vmem [#allocation10], %s1653_s27  ;;  %v1217_v20 = vsel %vm3491_vm11, %v4188_v29, %v1215_v35  ;;  %v1103_v42 = vsub.f32 %v1101_v50, %v3513_v62  ;;  %v1234_v34 = vsel %vm3481_vm10, %v3310_v57, %v1232_v17  ;;  %v1013_v30 = vmul.f32 %v3548_v12, %v2970_v16  ;;  %s3691_s27 = sadd.s32 %s1783_s29, %s3436_s20 }
 0x107   : > { %1186 = vst [vmem:[%s3648_s7] sm:$0xff] %v1184_v58  ;;  %1758 = vst [vmem:[%s3648_s7 + $0x10] sm:$0xff] %v1202_v4  ;;  %v1219_v9 = vsel %vm3562_vm13, %v1099_v49, %v1217_v20  ;;  %v1026_v53 = vadd.f32 %v1025_v55, %v1009_v1  ;;  %v1060_v46 = vsub.f32 %v3389_v36, %v3386_v5  ;;  %v3694_v57 = vmul.f32 0.25, %v3591_v19  ;;  %s1368_s11 = sshll.u32 %s2998_s12, 4  ;;  %s1320_s15 = sand.u32 1, %s2377_s26   ;;  %s3743_s11 = int_to_ptr.vmem [resolvable:$true] %s1368_s11 }
 0x108   : > { %v1221_v51 = vsel %vm3581_vm14, %v3472_v18, %v1219_v9  ;;  %v4189_v61 = vsub.f32 %v3433_v7, %v3383_v43  ;;  %v4192_v43 = vand.u32 1, %v3365_v31  ;;  %v1062_v7 = vmul.f32 3.0, %v3353_v52  ;;  %s1773_s28 = sshll.u32 %s3691_s27, 7  ;;  %s4198_s30 = sld [smem:[#allocation43_spill]] }
 0x109   : > { %1760 = vst [vmem:[%s3648_s7 + $0x20] sm:$0xff] %v1221_v51  ;;  %v1015_v38 = vmul.f32 %v3551_v21, %v2988_v45  ;;  %v1027_v0 = vadd.f32 %v1026_v53, %v1011_v23  ;;  %v3720_v31 = vmul.f32 3.0, %v3399_v39  ;;  %v3723_v28 = vmul.f32 2.0, %v3671_v26  ;;  %s2132_s18 = scalar_lea.vmem %s3743_s11, 1024  ;;  %s2303_s13 = smov [#allocation8]  }
 0x10a   : > { %v1236_v18 = vsel %vm3491_vm11, %v4189_v61, %v1234_v34  ;;  %vm3706_vm1 = vcmp.eq.s32.totalorder %v4192_v43, 1  ;;  %v3726_v27 = vmul.f32 2.0, %v3399_v39  ;;  %v1248_v45 = vadd.f32 %v3359_v44, %v3327_v37  ;;  %v4197_v44 = vld [vmem:[#allocation29_spill] sm:$0xff]  ;;  %p2133_p2 = scmp.ne.s32.totalorder %s3743_s11, %s2132_s18  ;;  %s2136_s16 = sshll.u32 %s2303_s13, 4  ;;  %s2137_s16 = int_to_ptr.vmem [resolvable:$false] %s2136_s16 }
 0x10b   : > { %v1238_v36 = vsel %vm3562_vm13, %v1103_v42, %v1236_v18  ;;  %v1028_v24 = vadd.f32 %v1027_v0, %v1013_v30  ;;  %vm3737_vm2 = vmand %vm1146_vm0, %vm3706_vm1  ;;  %v1171_v2 = vsel %vm3700_vm15, %v1060_v46, 0.0  ;;  %v1189_v12 = vsel %vm3700_vm15, %v3399_v39, 0.0  ;;  %s2138_s3 = scalar_lea.vmem %s2137_s16, 2048  ;;  %p2139_p3 = scmp.lt.s32.totalorder %s3743_s11, %s2137_s16 }
 0x10c   : > { %v1240_v62 = vsel %vm3581_vm14, %v3475_v40, %v1238_v36  ;;  %v1064_v21 = vsub.f32 %v1062_v7, %v4197_v44  ;;  %v3750_v10 = vmul.f32 3.0, %v3671_v26  ;;  %2034 = vrsqrt.f32 %v3694_v57  ;;  %vm3784_vm0 = vmand %vm1155_vm5, %vm3533_vm12  ;;  %p2134_p13 = pnand %p2133_p2, %p2405_p9  ;;  %p2140_p5 = scmp.lt.s32.totalorder %s2138_s3, %s2132_s18 }
 0x10d   : > { %1762 = vst [vmem:[%s3648_s7 + $0x30] sm:$0xff] %v1240_v62  ;;  %v1029_v6 = vadd.f32 %v1028_v24, %v1015_v38  ;;  %v1208_v54 = vsel %vm3700_vm15, %v3325_v22, 0.0  ;;  %v1227_v48 = vsel %vm3700_vm15, %v3353_v52, 0.0  ;;  %v1070_v14 = vsub.f32 %v3720_v31, %v3723_v28 }
 0x10e   : > { %s3764_s0 = scalar_lea.hbm %s4198_s30, %s1773_s28  ;;  %v1173_v32 = vsel %vm3737_vm2, %v3325_v22, %v1171_v2  ;;  %v1074_v25 = vsub.f32 %v3726_v27, %v3671_v26  ;;  %v3791_v22 = vsel %vm3737_vm2, %v3353_v52, %v1189_v12  ;;  %v1076_v1 = vsub.f32 %v3723_v28, %v3399_v39  ;;  %p2135_p4 = pneg %p2134_p13 }
 0x10f   : > { %1757 = vst [vmem:[%s2998_s12 + $0x38] sm:$0xff] %v1029_v6  ;;  %v3775_v60 = vmin.f32 %v3327_v37, %v1029_v6  ;;  %v3778_v47 = vmax.f32 %v3327_v37, %v1029_v6  ;;  %v1250_v19 = vadd.f32 %v1248_v45, %v1029_v6  ;;  %v3798_v8 = vsel %vm3737_vm2, %v3671_v26, %v1208_v54  ;;  %s3806_s12 = scalar_lea.sflag [#allocation9], %s1320_s15  ;;  %p2141_p1 = por %p2140_p5, %p2139_p3 }
 0x110   : > { %v1080_v33 = vsub.f32 %v3750_v10, %v3726_v27  ;;  %v3804_v13 = vsel %vm3737_vm2, %v1064_v21, %v1227_v48 }
 0x111   : > { %p2142_p6 = pnand %p2141_p1, %p2135_p4 }
 0x113   : > { %2145 = shalt.err (!%p2142_p6)
}
 0x114   : > { %s2146_s4 = scalar_lea.hbm %s3764_s0, 1024  ;;  %s2150_s29 = scalar_lea.hbm %s4198_s30, 6144 }
 0x115   : > { %p2147_p7 = scmp.ne.s32.totalorder %s3764_s0, %s2146_s4  ;;  %p2151_p8 = scmp.lt.s32.totalorder %s3764_s0, %s4198_s30 }
 0x116   : > { %p2152_p0 = scmp.lt.s32.totalorder %s2150_s29, %s2146_s4 }
 0x117   : > { %p2148_p10 = pnand %p2147_p7, %p2405_p9 }
 0x118   : > { %p2153_p2 = por %p2152_p0, %p2151_p8 }
 0x119   : > { %p2149_p11 = pneg %p2148_p10 }
 0x11b   : > { %p2154_p13 = pnand %p2153_p2, %p2149_p11 }
 0x11d   : > { %2157 = shalt.err (!%p2154_p13)
}
 0x11e   : > { %1791 = dma.vmem_to_hbm [thread:$0]  (%p2405_p9), %s3743_s11, 1024, %s3764_s0, %s3806_s12, %s2300_s17, %s2301_s21, %s2302_s10   ;;  %v1252_v52 = vmul.f32 0.25, %v1250_v19  ;;  %v1050_v49 = vmul.f32 2.0, %v3775_v60  ;;  %v1054_v11 = vmul.f32 2.0, %v3778_v47  ;;  %v1082_v59 = vmul.f32 3.0, %v3775_v60  ;;  %v4201_v29 = vld [vmem:[#allocation39_spill] sm:$0xff]  ;;  %vm3851_vm3 = vmand %vm1155_vm5, %vm3706_vm1  ;;  %v2035_v2 = vpop.eup %2034 }
 0x11f   : > { %v1175_v58 = vsel %vm3784_vm0, %v3775_v60, %v1173_v32  ;;  %v1193_v41 = vsel %vm3784_vm0, %v3778_v47, %v3791_v22  ;;  %v1086_v35 = vmul.f32 3.0, %v3778_v47  ;;  %v1282_v4 = vand.u32 2147483648, %v3694_v57  ;;  %v4202_v50 = vld [vmem:[#allocation26_spill] sm:$0xff]  ;;  %vm3862_vm7 = vmand %vm1160_vm6, %vm3533_vm12  ;;  %s1388_s11 = sshll.u32 %s3648_s7, 4  ;;  %s4213_s18 = sld [smem:[#allocation44_spill]]  ;;  %s3958_s11 = int_to_ptr.vmem [resolvable:$true] %s1388_s11 }
 0x120   : > { %v1254_v20 = vsub.f32 %v4201_v29, %v1252_v52  ;;  %v1258_v15 = vsub.f32 %v4202_v50, %v1252_v52  ;;  %v1264_v23 = vsub.f32 %v3327_v37, %v1252_v52  ;;  %v1270_v55 = vsub.f32 %v1029_v6, %v1252_v52  ;;  %vm3871_vm9 = vmand %vm1160_vm6, %vm3706_vm1  ;;  %s2158_s3 = scalar_lea.vmem %s3958_s11, 1024  ;;  %s2304_s4 = smov [#allocation10]  }
 0x121   : > { %vm1279_vm4 = vcmp.eq.f32.partialorder %v3694_v57, inf  ;;  %v1052_v17 = vsub.f32 %v1050_v49, %v3778_v47  ;;  %v1056_v51 = vsub.f32 %v1054_v11, %v3775_v60  ;;  %v1084_v42 = vsub.f32 %v1082_v59, %v1054_v11  ;;  %vm3879_vm10 = vmand %vm1165_vm8, %vm3533_vm12  ;;  %p2159_p4 = scmp.ne.s32.totalorder %s3958_s11, %s2158_s3  ;;  %s2162_s6 = sshll.u32 %s2304_s4, 4  ;;  %s2163_s6 = int_to_ptr.vmem [resolvable:$false] %s2162_s6 }
 0x122   : > { %v1088_v34 = vsub.f32 %v1086_v35, %v1050_v49  ;;  %vm1281_vm5 = vcmp.eq.f32.partialorder %v3694_v57, 0.0  ;;  %v1256_v30 = vmul.f32 %v1254_v20, %v1254_v20  ;;  %v1260_v53 = vmul.f32 %v1258_v15, %v1258_v15  ;;  %vm3889_vm6 = vmand %vm1165_vm8, %vm3706_vm1  ;;  %s2164_s27 = scalar_lea.vmem %s2163_s6, 2048  ;;  %p2165_p1 = scmp.lt.s32.totalorder %s3958_s11, %s2163_s6 }
 0x123   : > { %v1266_v46 = vmul.f32 %v1264_v23, %v1264_v23  ;;  %v1272_v61 = vmul.f32 %v1270_v55, %v1270_v55  ;;  %v1090_v16 = vmul.f32 3.0, %v1052_v17  ;;  %v1092_v43 = vmul.f32 2.0, %v1056_v51  ;;  %p2160_p3 = pnand %p2159_p4, %p2405_p9  ;;  %p2166_p6 = scmp.lt.s32.totalorder %s2164_s27, %s2158_s3 }
 0x124   : > { %v1177_v7 = vsel %vm3851_vm3, %v1084_v42, %v1175_v58  ;;  %v1096_v38 = vmul.f32 2.0, %v1052_v17  ;;  %v1262_v0 = vadd.f32 %v1260_v53, %v1256_v30  ;;  %v1195_v45 = vsel %vm3851_vm3, %v1052_v17, %v1193_v41 }
 0x125   : > { %v1179_v56 = vsel %vm3862_vm7, %v1070_v14, %v1177_v7  ;;  %v1212_v5 = vsel %vm3784_vm0, %v1056_v51, %v3798_v8  ;;  %v1094_v24 = vsub.f32 %v1090_v16, %v1092_v43  ;;  %v1197_v31 = vsel %vm3862_vm7, %v1074_v25, %v1195_v45  ;;  %s4214_s13 = smov %s4213_s18  ;;  %s3970_s16 = scalar_lea.hbm %s4213_s18, %s1773_s28 }
 0x126   : > { %v1181_v63 = vsel %vm3871_vm9, %v3399_v39, %v1179_v56  ;;  %v1098_v40 = vsub.f32 %v1096_v38, %v1056_v51  ;;  %v1268_v12 = vadd.f32 %v1266_v46, %v1262_v0  ;;  %v1199_v21 = vsel %vm3871_vm9, %v3671_v26, %v1197_v31  ;;  %p2161_p5 = pneg %p2160_p3  ;;  %p2167_p7 = por %p2166_p6, %p2165_p1 }
 0x127   : > { %v1183_v44 = vsel %vm3879_vm10, %v1052_v17, %v1181_v63  ;;  %v1100_v6 = vsub.f32 %v1092_v43, %v1052_v17  ;;  %v1201_v48 = vsel %vm3879_vm10, %v1056_v51, %v1199_v21  ;;  %v1214_v14 = vsel %vm3851_vm3, %v3775_v60, %v1212_v5 }
 0x128   : > { %v1185_v54 = vsel %vm3889_vm6, %v1094_v24, %v1183_v44  ;;  %v1102_v32 = vmul.f32 3.0, %v1056_v51  ;;  %v1274_v25 = vadd.f32 %v1272_v61, %v1268_v12  ;;  %v1203_v19 = vsel %vm3889_vm6, %v1098_v40, %v1201_v48  ;;  %p2168_p10 = pnand %p2167_p7, %p2161_p5 }
 0x129   : > { %1187 = vst [vmem:[%s3648_s7 + $0x8] sm:$0xff] %v1185_v54  ;;  %v1216_v22 = vsel %vm3862_vm7, %v3399_v39, %v1214_v14  ;;  %v1231_v8 = vsel %vm3784_vm0, %v1088_v34, %v3804_v13  ;;  %1759 = vst [vmem:[%s3648_s7 + $0x18] sm:$0xff] %v1203_v19  ;;  %v1278_v11 = vmul.f32 %v2035_v2, %v3694_v57 }
 0x12a   : > { %v1218_v60 = vsel %vm3871_vm9, %v1076_v1, %v1216_v22  ;;  %v1104_v52 = vsub.f32 %v1102_v32, %v1096_v38  ;;  %v1233_v49 = vsel %vm3851_vm3, %v3778_v47, %v1231_v8  ;;  %v1276_v59 = vmul.f32 0.25, %v1274_v25 }
 0x12b   : > { %v1220_v3 = vsel %vm3879_vm10, %v1100_v6, %v1218_v60  ;;  %v1235_v39 = vsel %vm3862_vm7, %v3671_v26, %v1233_v49  ;;  %v1280_v1 = vsel %vm1279_vm4, %v3694_v57, %v1278_v11 }
 0x12c   : > { %v1222_v28 = vsel %vm3889_vm6, %v1052_v17, %v1220_v3  ;;  %v1237_v47 = vsel %vm3871_vm9, %v1080_v33, %v1235_v39  ;;  %v1283_v13 = vsel %vm1281_vm5, %v1282_v4, %v1280_v1  ;;  %2036 = vrsqrt.f32 %v1276_v59 }
 0x12d   : > { %1761 = vst [vmem:[%s3648_s7 + $0x28] sm:$0xff] %v1222_v28  ;;  %v1239_v26 = vsel %vm3879_vm10, %v1104_v52, %v1237_v47  ;;  %v1291_v10 = vadd.f32 1e-05, %v1283_v13 }
 0x12e   : > { %v1241_v27 = vsel %vm3889_vm6, %v1056_v51, %v1239_v26 }
 0x12f   : > { %1763 = vst [vmem:[%s3648_s7 + $0x38] sm:$0xff] %v1241_v27  ;;  %2038 = vrcp.f32 %v1291_v10 }
 0x130   : > { %2171 = shalt.err (!%p2168_p10)
}
 0x131   : > { %s2172_s7 = scalar_lea.hbm %s3970_s16, 1024  ;;  %s2176_s29 = scalar_lea.hbm %s4214_s13, 6144 }
 0x132   : > { %p2173_p11 = scmp.ne.s32.totalorder %s3970_s16, %s2172_s7  ;;  %p2177_p2 = scmp.lt.s32.totalorder %s3970_s16, %s4214_s13 }
 0x133   : > { %p2178_p13 = scmp.lt.s32.totalorder %s2176_s29, %s2172_s7 }
 0x134   : > { %p2174_p8 = pnand %p2173_p11, %p2405_p9 }
 0x135   : > { %p2179_p4 = por %p2178_p13, %p2177_p2 }
 0x136   : > { %p2175_p0 = pneg %p2174_p8 }
 0x138   : > { %p2180_p3 = pnand %p2179_p4, %p2175_p0 }
 0x13a   : > { %2183 = shalt.err (!%p2180_p3)
}
 0x13b   : > { %1792 = dma.vmem_to_hbm [thread:$0]  (%p2405_p9), %s3958_s11, 1024, %s3970_s16, %s3806_s12, %s2300_s17, %s2301_s21, %s2302_s10   ;;  %v2037_v57 = vpop.eup %2036  ;;  %vm1286_vm8 = vcmp.eq.f32.partialorder %v1276_v59, inf  ;;  %v1289_v33 = vand.u32 2147483648, %v1276_v59  ;;  %vm1288_vm11 = vcmp.eq.f32.partialorder %v1276_v59, 0.0 }
 0x13c   : > { %v1285_v58 = vmul.f32 %v2037_v57, %v1276_v59  ;;  %v2039_v41 = vpop.eup %2038  ;;  %s1655_s17 = sshll.u32 %s2476_s5, 4  ;;  %s1785_s10 = smul.u32 6, %s2280_s22 }
 0x13d   : > { %v1294_v4 = vmul.f32 2.5, %v2039_v41  ;;  %s361_s21 = scalar_lea.vmem [#allocation11], %s1655_s17  ;;  %s4215_s16 = sld [smem:[#allocation45_spill]] }
 0x13e   : > { %v1287_v35 = vsel %vm1286_vm8, %v1276_v59, %v1285_v58  ;;  %s1405_s12 = sadd.s32 %s1785_s10, %s3436_s20  ;;  %s1409_s11 = sshll.u32 %s361_s21, 4  ;;  %s4002_s11 = int_to_ptr.vmem [resolvable:$true] %s1409_s11 }
 0x13f   : > { %v1290_v29 = vsel %vm1288_vm11, %v1289_v33, %v1287_v35  ;;  %v1297_v50 = vsub.f32 0.0, %v1294_v4  ;;  %s1777_s14 = sshll.u32 %s1405_s12, 7  ;;  %s1331_s4 = scalar_lea.sflag [#allocation12], %s2476_s5 }
 0x140   : > { %v1292_v20 = vadd.f32 1e-05, %v1290_v29  ;;  %s2184_s6 = scalar_lea.vmem %s4002_s11, 256  ;;  %s2305_s22 = smov [#allocation11]  }
 0x141   : > { %v1299_v15 = vmul.f32 1.442695, %v1297_v50  ;;  %p2185_p5 = scmp.ne.s32.totalorder %s4002_s11, %s2184_s6  ;;  %s2188_s20 = sshll.u32 %s2305_s22, 4  ;;  %s2189_s20 = int_to_ptr.vmem [resolvable:$false] %s2188_s20 }
 0x142   : > { %2040 = vrcp.f32 %v1292_v20  ;;  %s2190_s27 = scalar_lea.vmem %s2189_s20, 512  ;;  %p2191_p7 = scmp.lt.s32.totalorder %s4002_s11, %s2189_s20 }
 0x143   : > { %2042 = vpow2.f32 %v1299_v15  ;;  %s1407_s3 = scalar_lea.hbm %s4215_s16, %s1777_s14  ;;  %p2186_p1 = pnand %p2185_p5, %p2405_p9 }
 0x144   : > { %p2192_p10 = scmp.lt.s32.totalorder %s2190_s27, %s2184_s6 }
 0x145   : > { %p2187_p6 = pneg %p2186_p1 }
 0x146   : > { %p2193_p11 = por %p2192_p10, %p2191_p7 }
 0x148   : > { %p2194_p8 = pnand %p2193_p11, %p2187_p6 }
 0x14f   : > { %v2041_v23 = vpop.eup %2040 }
 0x150   : > { %v1296_v55 = vmul.f32 2.5, %v2041_v23  ;;  %v2043_v9 = vpop.eup %2042 }
 0x151   : > { %v1303_v51 = vadd.f32 1.0, %v2043_v9 }
 0x152   : > { %v1298_v17 = vsub.f32 0.0, %v1296_v55 }
 0x153   : > { %2044 = vrcp.f32 %v1303_v51 }
 0x154   : > { %v1301_v42 = vmul.f32 1.442695, %v1298_v17 }
 0x156   : > { %2046 = vpow2.f32 %v1301_v42 }
 0x160   : > { %v2045_v37 = vpop.eup %2044 }
 0x161   : > { %v1764_v30 = vadd.f32 -0.5, %v2045_v37 }
 0x163   : > { %v2047_v34 = vpop.eup %2046  ;;  %v1311_v46 = vmul.f32 2.0, %v1764_v30 }
 0x164   : > { %v1304_v53 = vadd.f32 1.0, %v2047_v34 }
 0x165   : > { %1313 = vst [vmem:[%s361_s21] sm:$0xff] %v1311_v46 }
 0x166   : > { %2048 = vrcp.f32 %v1304_v53 }
 0x173   : > { %v2049_v61 = vpop.eup %2048 }
 0x174   : > { %v1765_v18 = vadd.f32 -0.5, %v2049_v61 }
 0x176   : > { %v1312_v16 = vmul.f32 2.0, %v1765_v18 }
 0x178   : > { %1314 = vst [vmem:[%s361_s21 + $0x8] sm:$0xff] %v1312_v16 }
 0x179   : > { %2197 = shalt.err (!%p2194_p8)
}
 0x17a   : > { %s2198_s7 = scalar_lea.hbm %s1407_s3, 256  ;;  %s2202_s8 = scalar_lea.hbm %s4215_s16, 1536 }
 0x17b   : > { %p2199_p0 = scmp.ne.s32.totalorder %s1407_s3, %s2198_s7  ;;  %p2203_p4 = scmp.lt.s32.totalorder %s1407_s3, %s4215_s16 }
 0x17c   : > { %p2204_p3 = scmp.lt.s32.totalorder %s2202_s8, %s2198_s7 }
 0x17d   : > { %p2200_p2 = pnand %p2199_p0, %p2405_p9 }
 0x17e   : > { %p2205_p5 = por %p2204_p3, %p2203_p4 }
 0x17f   : > { %p2201_p13 = pneg %p2200_p2 }
 0x181   : > { %p2206_p1 = pnand %p2205_p5, %p2201_p13 }
 0x183   : > { %2209 = shalt.err (!%p2206_p1)
}
 0x184   : > { %1793 = dma.vmem_to_hbm [thread:$0]  (%p2405_p9), %s4002_s11, 256, %s1407_s3, %s1331_s4  }
 0x185 PF: > { %s4216_s26 = sld [smem:[#allocation18_spill]]  ;;  %p1819_p6 = scmp.ge.s32.totalorder %s2292_s25, 2 }
 0x187   : > { %p1806_p7 = pnand %p1819_p6, %p2413_p12 }
 0x189   : > { %p1807_p10 = pneg %p1806_p7 }
 0x18b   : > { %s1421_s21 = sand.u32 1, %s4216_s26  }
 0x18c   : > { %s1422_s10 = scalar_lea.sflag [#allocation4], %s1421_s21 }
 0x18d   : > { %2251 = dma.done.wait (%p1807_p10), %s1422_s10, 8192  }
 0x18e   : > { %2253 = vsyncadd (%p1807_p10), %s1422_s10, 4294959104  ;;  %s4218_s12 = sadd.s32 4294967294, %s2292_s25  }
 0x18f   : > { %s1430_s14 = sand.u32 1, %s4218_s12  }
 0x190   : > { %s1431_s0 = scalar_lea.sflag [#allocation9], %s1430_s14 }
 0x191   : > { %2255 = dma.done.wait (%p1807_p10), %s1431_s0, 2048  }
 0x192   : > { %2257 = vsyncadd (%p1807_p10), %s1431_s0, 4294965248  ;;  %s1449_s9 = scalar_lea.sflag [#allocation12], %s1421_s21 }
 0x193   : > { %2259 = dma.done.wait (%p1807_p10), %s1449_s9, 256  }
 0x194   : > { %2261 = vsyncadd (%p1807_p10), %s1449_s9, 4294967040  ;;  %s31_s25 = sadd.s32 1, %s2292_s25   ;;  %s4219_s11 = sld [smem:[#allocation19_spill]] }
 0x195   : > { %p28_p9 = scmp.ge.s32.totalorder %s31_s25, 8   ;;  %s4220_s20 = sld [smem:[#allocation23_spill]] }
 0x196   : > { %s4221_s3 = sld [smem:[#allocation20_spill]]  ;;  %s4223_s18 = smov %s2268_s19 }
 0x197   : > { %s4222_s4 = sld [smem:[#allocation21_spill]]  ;;  %s4225_s21 = smov %s2284_s23 }
 0x198   : > { %s4226_s22 = smov %s2288_s24 }
 0x199   :  { %30 = sbr.rel (!%p28_p9) target bundleno = 18 (0x12), region = 147 }
 0x19a   : > { %s4224_s19 = smov %s4219_s11 }
 0x19c   : > { %s4227_s23 = smov %s4221_s3 }
 0x19d   : > { %s4228_s24 = smov %s4222_s4 }
 0x19e   :  { %1454 = vsyncpa [#allocation3], 1 }
 0x19f   :  { %1456 = vsyncpa [#allocation3 + $0x1], 1 }
 0x1a0   :  { %1457 = vsyncpa [#allocation6], 1 }
 0x1a1   :  { %1459 = vsyncpa [#allocation6 + $0x1], 1 }
 0x1a2   :  { %1460 = vsyncpa [#allocation4], 1 }
 0x1a3   :  { %1462 = vsyncpa [#allocation4 + $0x1], 1 }
 0x1a4   :  { %1463 = vsyncpa [#allocation9], 1 }
 0x1a5   :  { %1465 = vsyncpa [#allocation9 + $0x1], 1 }
 0x1a6   :  { %1466 = vsyncpa [#allocation12], 1 }
 0x1a7   :  { %1468 = vsyncpa [#allocation12 + $0x1], 1 }

</bundles_post_ra>
